<compile_context>
chip_gen: v7x
topology: tpu7x:2x2x1
jax: 0.10.0
libtpu: 0.0.40
codegen_flags: <defaults>
</compile_context>

<pallas_src>
import jax
import jax.numpy as jnp
from jax import lax
from jax.experimental import pallas as pl
from jax.experimental.pallas import tpu as pltpu


def gru_avg_kernel(x_ref, len_ref, wih_ref, whhf_ref, whhb_ref,
                   b6_ref, bhnf_ref, bhnb_ref, out_ref, gif_ref, gib_ref):
    """One batch tile: bidirectional GRU over (T, TB, H) + masked average -> (TB, H)."""
    T, TB, H = x_ref.shape
    H2, H3 = 2 * H, 3 * H

    # ---- Hoisted input-path matmul: all timesteps of both directions in one bf16 MXU call.
    #      r/z biases (b_ih + b_hh) and b_ih_n are folded into b6 (bias folding).
    x2d = x_ref[...].reshape(T * TB, H).astype(jnp.bfloat16)
    gi = jnp.dot(x2d, wih_ref[...], preferred_element_type=jnp.float32)      # (T*TB, 6H) f32
    gif_ref[...] = (gi[:, :H3] + b6_ref[:, :H3]).reshape(T, TB, H3)          # fwd (r,z,n) per t
    gib_ref[...] = (gi[:, H3:] + b6_ref[:, H3:]).reshape(T, TB, H3)          # bwd (r,z,n) per t

    # Hoisted loop invariants (JAX does not CSE broadcast_in_dim inside loops).
    lens = len_ref[...]                                          # (TB, 1) int32
    bhn_f = jnp.broadcast_to(bhnf_ref[...], (TB, H))             # b_hh_n stays inside r*(...)
    bhn_b = jnp.broadcast_to(bhnb_ref[...], (TB, H))

    def step(t, carry):
        # Interleaved fwd/bwd recurrences: fwd processes time t, bwd processes time T-1-t.
        h_f, h_b, acc = carry
        rt = T - 1 - t
        gi_f = gif_ref[t]                                        # (TB, 3H)
        gi_b = gib_ref[rt]                                       # (TB, 3H)

        # Kept as two small f32 matmuls on purpose (see header): weight-streaming bound.
        gh_f = jnp.dot(h_f, whhf_ref[...], preferred_element_type=jnp.float32)   # (TB, 3H)
        gh_b = jnp.dot(h_b, whhb_ref[...], preferred_element_type=jnp.float32)

        # Gate math in f32; all slices are 128-lane aligned and TB (mult of 8) fills sublanes.
        rz_f = jax.nn.sigmoid(gi_f[:, :H2] + gh_f[:, :H2])
        rz_b = jax.nn.sigmoid(gi_b[:, :H2] + gh_b[:, :H2])
        n_f = jnp.tanh(gi_f[:, H2:] + rz_f[:, :H] * (gh_f[:, H2:] + bhn_f))
        n_b = jnp.tanh(gi_b[:, H2:] + rz_b[:, :H] * (gh_b[:, H2:] + bhn_b))
        # (1-z)*n + z*h  ==  n + z*(h-n): one fewer VPU op on the serial carry path.
        hn_f = n_f + rz_f[:, H:] * (h_f - n_f)
        hn_b = n_b + rz_b[:, H:] * (h_b - n_b)

        # Mask recomputed from lengths (prefix-valid masks, exactly what pack_padded requires).
        valid_f = t < lens                                       # (TB, 1) bool
        valid_b = rt < lens
        h_f = jnp.where(valid_f, hn_f, h_f)                      # freeze state on padded steps
        h_b = jnp.where(valid_b, hn_b, h_b)
        acc = acc + jnp.where(valid_f, hn_f, 0.0) + jnp.where(valid_b, hn_b, 0.0)
        return h_f, h_b, acc

    zeros = jnp.zeros((TB, H), jnp.float32)
    carry = (zeros, zeros, zeros)
    # Manual unroll-by-2 (T is static): cross-step scheduling visibility, fewer loop bundles.
    if T // 2 > 0:
        carry = lax.fori_loop(0, T // 2,
                              lambda i, c: step(2 * i + 1, step(2 * i, c)), carry)
    if T % 2:
        carry = step(T - 1, carry)
    _, _, acc = carry

    # tonorm=True normalization; max(.,1) guards all-padding rows (PyTorch would NaN there,
    # but pack_padded_sequence forbids zero lengths anyway).
    cnt = jnp.maximum(lens.astype(jnp.float32), 1.0)             # (TB, 1)
    out_ref[...] = acc / cnt


def encoder_rnn_avg(input_seq, input_mask, params, *, batch_tile=None):
    """Embedding lookup (XLA glue) + Pallas bidirectional-GRU / masked-average kernel."""
    emb = params["embedding"][input_seq].astype(jnp.float32)     # (T, B, H)
    T, B, H = emb.shape
    assert H % 128 == 0, "H must be a multiple of 128 for lane-dense gates/output"
    H3 = 3 * H

    # Per-row valid lengths; mask is reconstructed in-kernel (prefix-valid assumption).
    lengths = input_mask.astype(jnp.int32).sum(axis=0).reshape(B, 1)

    if batch_tile is None:
        # Larger batch tiles amortize per-step recurrent-weight streaming over more rows;
        # bounded by the VMEM footprint of the x tile (double-buffered) + the two gi scratches.
        per_row = T * H * 4 * (2 + 6)
        tb = 8
        while tb < 64 and 2 * tb <= ((B + 7) // 8) * 8 and per_row * 2 * tb <= 40 * 2 ** 20:
            tb *= 2
        batch_tile = tb
    assert batch_tile % 8 == 0
    TB = batch_tile

    # Pad batch to a multiple of the tile; padded rows have length 0 and are dropped at the end.
    Bp = ((B + TB - 1) // TB) * TB
    if Bp != B:
        emb = jnp.pad(emb, ((0, 0), (0, Bp - B), (0, 0)))
        lengths = jnp.pad(lengths, ((0, Bp - B), (0, 0)))

    # Weight prep: concatenated, pre-transposed input weights (bf16 for the hoisted MXU matmul);
    # recurrent weights stay f32; r/z biases pre-summed, b_ih_n folded, b_hh_n kept separate.
    wih_cat = jnp.concatenate([params["w_ih_f"].T, params["w_ih_b"].T],
                              axis=1).astype(jnp.bfloat16)        # (H, 6H)
    whhf_t = params["w_hh_f"].T.astype(jnp.float32)               # (H, 3H)
    whhb_t = params["w_hh_b"].T.astype(jnp.float32)

    def fold(b_ih, b_hh):                                         # r,z: b_ih+b_hh ; n: b_ih only
        return jnp.concatenate([b_ih[:2 * H] + b_hh[:2 * H], b_ih[2 * H:]])

    b6 = jnp.concatenate([fold(params["b_ih_f"], params["b_hh_f"]),
                          fold(params["b_ih_b"], params["b_hh_b"])])[None, :].astype(jnp.float32)
    bhn_f = params["b_hh_f"][2 * H:][None, :].astype(jnp.float32)  # (1, H)
    bhn_b = params["b_hh_b"][2 * H:][None, :].astype(jnp.float32)

    # VMEM budget sized to the actual tiles (double-buffered in/out + gi scratch + weights).
    # TODO(synk): for very long T on v7x (64 MiB VMEM), add an "arbitrary" time-chunk grid axis
    # and carry h/acc in VMEM scratch instead of keeping the full (T, TB, *) tile resident.
    vmem_bytes = (
        2 * T * TB * H * 4            # x tile, double-buffered
        + 2 * T * TB * H3 * 4         # fwd/bwd gi scratch
        + 2 * TB * H * 4              # out tile, double-buffered
        + 2 * (wih_cat.size * 2 + (whhf_t.size + whhb_t.size + b6.size + 2 * H) * 4)
    )
    vmem_limit = int(min(110 * 2 ** 20, max(2 * vmem_bytes, 4 * 2 ** 20)))

    out = pl.pallas_call(
        gru_avg_kernel,
        out_shape=jax.ShapeDtypeStruct((Bp, H), jnp.float32),
        grid_spec=pltpu.PrefetchScalarGridSpec(
            num_scalar_prefetch=0,
            grid=(Bp // TB,),                                     # batch tiles
            in_specs=[
                pl.BlockSpec((T, TB, H), lambda i: (0, i, 0)),    # x (time-major)
                pl.BlockSpec((TB, 1), lambda i: (i, 0)),          # lengths
                pl.BlockSpec((H, 6 * H), lambda i: (0, 0)),       # [Wih_f | Wih_b]^T  (bf16)
                pl.BlockSpec((H, H3), lambda i: (0, 0)),          # Whh_f^T
                pl.BlockSpec((H, H3), lambda i: (0, 0)),          # Whh_b^T
                pl.BlockSpec((1, 6 * H), lambda i: (0, 0)),       # folded input-path biases
                pl.BlockSpec((1, H), lambda i: (0, 0)),           # b_hh_n fwd
                pl.BlockSpec((1, H), lambda i: (0, 0)),           # b_hh_n bwd
            ],
            out_specs=pl.BlockSpec((TB, H), lambda i: (i, 0)),
            scratch_shapes=[pltpu.VMEM((T, TB, H3), jnp.float32),
                            pltpu.VMEM((T, TB, H3), jnp.float32)],
        ),
        compiler_params=pltpu.CompilerParams(
            dimension_semantics=("parallel",),
            vmem_limit_bytes=vmem_limit),
    )(emb, lengths, wih_cat, whhf_t, whhb_t, b6, bhn_f, bhn_b)
    return out[:B]


def reference(input_seq, input_mask, params):
    """Pure-JAX f32 reference mirroring the PyTorch forward pass."""
    emb = params["embedding"][input_seq].astype(jnp.float32)
    mask = input_mask.astype(jnp.float32)
    T, B, H = emb.shape

    def cell(x_t, h, wih, whh, bih, bhh):
        gi = x_t @ wih.T + bih
        gh = h @ whh.T + bhh
        r = jax.nn.sigmoid(gi[:, :H] + gh[:, :H])
        z = jax.nn.sigmoid(gi[:, H:2 * H] + gh[:, H:2 * H])
        n = jnp.tanh(gi[:, 2 * H:] + r * gh[:, 2 * H:])
        return (1 - z) * n + z * h

    acc = jnp.zeros((B, H), jnp.float32)
    h = jnp.zeros((B, H), jnp.float32)
    for t in range(T):
        hn = cell(emb[t], h, params["w_ih_f"], params["w_hh_f"],
                  params["b_ih_f"], params["b_hh_f"])
        mt = mask[t][:, None]
        h = mt * hn + (1 - mt) * h
        acc = acc + mt * hn
    h = jnp.zeros((B, H), jnp.float32)
    for t in range(T - 1, -1, -1):
        hn = cell(emb[t], h, params["w_ih_b"], params["w_hh_b"],
                  params["b_ih_b"], params["b_hh_b"])
        mt = mask[t][:, None]
        h = mt * hn + (1 - mt) * h
        acc = acc + mt * hn
    return acc / mask.sum(0)[:, None]


def make_params(key, vocab, hidden):
    ks = jax.random.split(key, 9)
    s = 0.1
    return {
        "embedding": s * jax.random.normal(ks[0], (vocab, hidden), jnp.float32),
        "w_ih_f": s * jax.random.normal(ks[1], (3 * hidden, hidden), jnp.float32),
        "w_hh_f": s * jax.random.normal(ks[2], (3 * hidden, hidden), jnp.float32),
        "b_ih_f": s * jax.random.normal(ks[3], (3 * hidden,), jnp.float32),
        "b_hh_f": s * jax.random.normal(ks[4], (3 * hidden,), jnp.float32),
        "w_ih_b": s * jax.random.normal(ks[5], (3 * hidden, hidden), jnp.float32),
        "w_hh_b": s * jax.random.normal(ks[6], (3 * hidden, hidden), jnp.float32),
        "b_ih_b": s * jax.random.normal(ks[7], (3 * hidden,), jnp.float32),
        "b_hh_b": s * jax.random.normal(ks[8], (3 * hidden,), jnp.float32),
    }


if __name__ == "__main__":
    T, B, H, VOCAB = 8, 8, 128, 32

    key = jax.random.PRNGKey(0)
    k_tok, k_par = jax.random.split(key)
    params = make_params(k_par, VOCAB, H)

    input_seq = jax.random.randint(k_tok, (T, B), 0, VOCAB, dtype=jnp.int32)
    # Prefix-valid masks (what pack_padded_sequence requires); max length == T.
    lengths = jnp.array([8, 5, 3, 6, 8, 1, 7, 4], dtype=jnp.int32)
    input_mask = (jnp.arange(T, dtype=jnp.int32)[:, None] < lengths[None, :]).astype(jnp.int32)

    out = jax.jit(encoder_rnn_avg)(input_seq, input_mask, params)
    out = jax.block_until_ready(out)

    ref = reference(input_seq, input_mask, params)
    assert out.shape == (B, H)
    # bf16 is used only on the hoisted input-path matmul; state/gate math is f32, so the
    # kernel tracks the f32 reference to ~1e-3.
    assert jnp.allclose(out, ref, atol=2e-2, rtol=2e-2), float(jnp.max(jnp.abs(out - ref)))

    print("KERNEL_OK")
</pallas_src>

<mosaic_0001>
module attributes {stable_mosaic.version = 11 : i64} {
  func.func @gru_avg_kernel(%arg0: i32, %arg1: memref<8x8x128xf32, #tpu.memory_space<vmem>>, %arg2: memref<8x1xi32, #tpu.memory_space<vmem>>, %arg3: memref<128x768xbf16, #tpu.memory_space<vmem>>, %arg4: memref<128x384xf32, #tpu.memory_space<vmem>>, %arg5: memref<128x384xf32, #tpu.memory_space<vmem>>, %arg6: memref<1x768xf32, #tpu.memory_space<vmem>>, %arg7: memref<1x128xf32, #tpu.memory_space<vmem>>, %arg8: memref<1x128xf32, #tpu.memory_space<vmem>>, %arg9: memref<8x128xf32, #tpu.memory_space<vmem>>, %arg10: memref<8x8x384xf32, #tpu.memory_space<vmem>>, %arg11: memref<8x8x384xf32, #tpu.memory_space<vmem>>) attributes {dimension_semantics = [#tpu.dimension_semantics<parallel>], iteration_bounds = array<i64: 1>, scalar_prefetch = 0 : i64, scratch_operands = 2 : i64, tpu.core_type = #tpu.core_type<tc>, window_params = [{transform_indices = @transform_0, window_bounds = array<i64: 8, 8, 128>}, {transform_indices = @transform_1, window_bounds = array<i64: 8, 1>}, {pipeline_mode = #tpu.pipeline_mode<synchronous>, transform_indices = @transform_2, window_bounds = array<i64: 128, 768>}, {pipeline_mode = #tpu.pipeline_mode<synchronous>, transform_indices = @transform_3, window_bounds = array<i64: 128, 384>}, {pipeline_mode = #tpu.pipeline_mode<synchronous>, transform_indices = @transform_4, window_bounds = array<i64: 128, 384>}, {pipeline_mode = #tpu.pipeline_mode<synchronous>, transform_indices = @transform_5, window_bounds = array<i64: 1, 768>}, {pipeline_mode = #tpu.pipeline_mode<synchronous>, transform_indices = @transform_6, window_bounds = array<i64: 1, 128>}, {pipeline_mode = #tpu.pipeline_mode<synchronous>, transform_indices = @transform_7, window_bounds = array<i64: 1, 128>}, {transform_indices = @transform_8, window_bounds = array<i64: 8, 128>}]} {
    %c0 = arith.constant 0 : index
    %c0_0 = arith.constant 0 : index
    %c0_1 = arith.constant 0 : index
    %0 = vector.load %arg1[%c0, %c0_0, %c0_1] : memref<8x8x128xf32, #tpu.memory_space<vmem>>, vector<8x8x128xf32>
    %1 = vector.shape_cast %0 : vector<8x8x128xf32> to vector<64x128xf32>
    %2 = arith.truncf %1 : vector<64x128xf32> to vector<64x128xbf16>
    %c0_2 = arith.constant 0 : index
    %c0_3 = arith.constant 0 : index
    %3 = vector.load %arg3[%c0_2, %c0_3] : memref<128x768xbf16, #tpu.memory_space<vmem>>, vector<128x768xbf16>
    %cst = arith.constant dense<0.000000e+00> : vector<64x768xf32>
    %4 = tpu.matmul %2, %3, %cst {dimension_numbers = #tpu.dot_dimension_numbers<[1], [0], [0], [1], [0, 0, 1, 1], [], []>} : vector<64x128xbf16>, vector<128x768xbf16>, vector<64x768xf32> -> vector<64x768xf32>
    %5 = vector.extract_strided_slice %4 {offsets = [0, 0], sizes = [64, 384], strides = [1, 1]} : vector<64x768xf32> to vector<64x384xf32>
    %c0_4 = arith.constant 0 : index
    %c0_5 = arith.constant 0 : index
    %6 = vector.load %arg6[%c0_4, %c0_5] : memref<1x768xf32, #tpu.memory_space<vmem>>, vector<1x384xf32>
    %7 = vector.broadcast %6 : vector<1x384xf32> to vector<64x384xf32>
    %8 = arith.addf %5, %7 : vector<64x384xf32>
    %9 = vector.shape_cast %8 : vector<64x384xf32> to vector<8x8x384xf32>
    %c0_6 = arith.constant 0 : index
    %c0_7 = arith.constant 0 : index
    %c0_8 = arith.constant 0 : index
    %10 = vector.load %arg10[%c0_6, %c0_7, %c0_8] : memref<8x8x384xf32, #tpu.memory_space<vmem>>, vector<8x8x384xf32>
    tpu.vector_store %arg10[%c0_6, %c0_7, %c0_8], %9 {strides = array<i32>} : memref<8x8x384xf32, #tpu.memory_space<vmem>>, vector<8x8x384xf32>,
    %11 = vector.extract_strided_slice %4 {offsets = [0, 384], sizes = [64, 384], strides = [1, 1]} : vector<64x768xf32> to vector<64x384xf32>
    %c0_9 = arith.constant 0 : index
    %c384 = arith.constant 384 : index
    %12 = vector.load %arg6[%c0_9, %c384] : memref<1x768xf32, #tpu.memory_space<vmem>>, vector<1x384xf32>
    %13 = vector.broadcast %12 : vector<1x384xf32> to vector<64x384xf32>
    %14 = arith.addf %11, %13 : vector<64x384xf32>
    %15 = vector.shape_cast %14 : vector<64x384xf32> to vector<8x8x384xf32>
    %c0_10 = arith.constant 0 : index
    %c0_11 = arith.constant 0 : index
    %c0_12 = arith.constant 0 : index
    %16 = vector.load %arg11[%c0_10, %c0_11, %c0_12] : memref<8x8x384xf32, #tpu.memory_space<vmem>>, vector<8x8x384xf32>
    tpu.vector_store %arg11[%c0_10, %c0_11, %c0_12], %15 {strides = array<i32>} : memref<8x8x384xf32, #tpu.memory_space<vmem>>, vector<8x8x384xf32>,
    %c0_13 = arith.constant 0 : index
    %c0_14 = arith.constant 0 : index
    %17 = vector.load %arg2[%c0_13, %c0_14] : memref<8x1xi32, #tpu.memory_space<vmem>>, vector<8x1xi32>
    %c0_15 = arith.constant 0 : index
    %c0_16 = arith.constant 0 : index
    %18 = vector.load %arg7[%c0_15, %c0_16] : memref<1x128xf32, #tpu.memory_space<vmem>>, vector<1x128xf32>
    %19 = vector.shape_cast %18 : vector<1x128xf32> to vector<1x128xf32>
    %20 = vector.broadcast %19 : vector<1x128xf32> to vector<8x128xf32>
    %c0_17 = arith.constant 0 : index
    %c0_18 = arith.constant 0 : index
    %21 = vector.load %arg8[%c0_17, %c0_18] : memref<1x128xf32, #tpu.memory_space<vmem>>, vector<1x128xf32>
    %22 = vector.shape_cast %21 : vector<1x128xf32> to vector<1x128xf32>
    %23 = vector.broadcast %22 : vector<1x128xf32> to vector<8x128xf32>
    %cst_19 = arith.constant 0.000000e+00 : f32
    %24 = vector.broadcast %cst_19 : f32 to vector<8x128xf32>
    %c0_i32 = arith.constant 0 : i32
    %c4_i32 = arith.constant 4 : i32
    %25 = arith.addi %c0_i32, %c4_i32 : i32
    %c1_i32 = arith.constant 1 : i32
    %26:3 = scf.for %arg12 = %c0_i32 to %25 step %c1_i32 iter_args(%arg13 = %24, %arg14 = %24, %arg15 = %24) -> (vector<8x128xf32>, vector<8x128xf32>, vector<8x128xf32>)  : i32 {
      %c2_i32 = arith.constant 2 : i32
      %33 = arith.muli %c2_i32, %arg12 : i32
      %c1_i32_24 = arith.constant 1 : i32
      %34 = arith.addi %33, %c1_i32_24 : i32
      %c2_i32_25 = arith.constant 2 : i32
      %35 = arith.muli %c2_i32_25, %arg12 : i32
      %c7_i32 = arith.constant 7 : i32
      %36 = arith.subi %c7_i32, %35 : i32
      %37 = arith.index_cast %35 : i32 to index
      %c0_26 = arith.constant 0 : index
      %c0_27 = arith.constant 0 : index
      %38 = vector.load %arg10[%37, %c0_26, %c0_27] : memref<8x8x384xf32, #tpu.memory_space<vmem>>, vector<1x8x384xf32>
      %39 = vector.shape_cast %38 : vector<1x8x384xf32> to vector<8x384xf32>
      %40 = arith.index_cast %36 : i32 to index
      %c0_28 = arith.constant 0 : index
      %c0_29 = arith.constant 0 : index
      %41 = vector.load %arg11[%40, %c0_28, %c0_29] : memref<8x8x384xf32, #tpu.memory_space<vmem>>, vector<1x8x384xf32>
      %42 = vector.shape_cast %41 : vector<1x8x384xf32> to vector<8x384xf32>
      %c0_30 = arith.constant 0 : index
      %c0_31 = arith.constant 0 : index
      %43 = vector.load %arg4[%c0_30, %c0_31] : memref<128x384xf32, #tpu.memory_space<vmem>>, vector<128x384xf32>
      %cst_32 = arith.constant dense<0.000000e+00> : vector<8x384xf32>
      %44 = tpu.matmul %arg13, %43, %cst_32 {dimension_numbers = #tpu.dot_dimension_numbers<[1], [0], [0], [1], [0, 0, 1, 1], [], []>} : vector<8x128xf32>, vector<128x384xf32>, vector<8x384xf32> -> vector<8x384xf32>
      %c0_33 = arith.constant 0 : index
      %c0_34 = arith.constant 0 : index
      %45 = vector.load %arg5[%c0_33, %c0_34] : memref<128x384xf32, #tpu.memory_space<vmem>>, vector<128x384xf32>
      %cst_35 = arith.constant dense<0.000000e+00> : vector<8x384xf32>
      %46 = tpu.matmul %arg14, %45, %cst_35 {dimension_numbers = #tpu.dot_dimension_numbers<[1], [0], [0], [1], [0, 0, 1, 1], [], []>} : vector<8x128xf32>, vector<128x384xf32>, vector<8x384xf32> -> vector<8x384xf32>
      %47 = vector.extract_strided_slice %39 {offsets = [0, 0], sizes = [8, 256], strides = [1, 1]} : vector<8x384xf32> to vector<8x256xf32>
      %48 = vector.extract_strided_slice %44 {offsets = [0, 0], sizes = [8, 256], strides = [1, 1]} : vector<8x384xf32> to vector<8x256xf32>
      %49 = arith.addf %47, %48 : vector<8x256xf32>
      %50 = arith.negf %49 : vector<8x256xf32>
      %51 = math.exp %50 : vector<8x256xf32>
      %cst_36 = arith.constant 1.000000e+00 : f32
      %52 = vector.broadcast %cst_36 : f32 to vector<8x256xf32>
      %53 = arith.addf %52, %51 : vector<8x256xf32>
      %54 = arith.divf %52, %53 : vector<8x256xf32>
      %55 = vector.extract_strided_slice %42 {offsets = [0, 0], sizes = [8, 256], strides = [1, 1]} : vector<8x384xf32> to vector<8x256xf32>
      %56 = vector.extract_strided_slice %46 {offsets = [0, 0], sizes = [8, 256], strides = [1, 1]} : vector<8x384xf32> to vector<8x256xf32>
      %57 = arith.addf %55, %56 : vector<8x256xf32>
      %58 = arith.negf %57 : vector<8x256xf32>
      %59 = math.exp %58 : vector<8x256xf32>
      %cst_37 = arith.constant 1.000000e+00 : f32
      %60 = vector.broadcast %cst_37 : f32 to vector<8x256xf32>
      %61 = arith.addf %60, %59 : vector<8x256xf32>
      %62 = arith.divf %60, %61 : vector<8x256xf32>
      %63 = vector.extract_strided_slice %39 {offsets = [0, 256], sizes = [8, 128], strides = [1, 1]} : vector<8x384xf32> to vector<8x128xf32>
      %64 = vector.extract_strided_slice %54 {offsets = [0, 0], sizes = [8, 128], strides = [1, 1]} : vector<8x256xf32> to vector<8x128xf32>
      %65 = vector.extract_strided_slice %44 {offsets = [0, 256], sizes = [8, 128], strides = [1, 1]} : vector<8x384xf32> to vector<8x128xf32>
      %66 = arith.addf %65, %20 : vector<8x128xf32>
      %67 = arith.mulf %64, %66 : vector<8x128xf32>
      %68 = arith.addf %63, %67 : vector<8x128xf32>
      %69 = math.tanh %68 : vector<8x128xf32>
      %70 = vector.extract_strided_slice %42 {offsets = [0, 256], sizes = [8, 128], strides = [1, 1]} : vector<8x384xf32> to vector<8x128xf32>
      %71 = vector.extract_strided_slice %62 {offsets = [0, 0], sizes = [8, 128], strides = [1, 1]} : vector<8x256xf32> to vector<8x128xf32>
      %72 = vector.extract_strided_slice %46 {offsets = [0, 256], sizes = [8, 128], strides = [1, 1]} : vector<8x384xf32> to vector<8x128xf32>
      %73 = arith.addf %72, %23 : vector<8x128xf32>
      %74 = arith.mulf %71, %73 : vector<8x128xf32>
      %75 = arith.addf %70, %74 : vector<8x128xf32>
      %76 = math.tanh %75 : vector<8x128xf32>
      %77 = vector.extract_strided_slice %54 {offsets = [0, 128], sizes = [8, 128], strides = [1, 1]} : vector<8x256xf32> to vector<8x128xf32>
      %78 = arith.subf %arg13, %69 : vector<8x128xf32>
      %79 = arith.mulf %77, %78 : vector<8x128xf32>
      %80 = arith.addf %69, %79 : vector<8x128xf32>
      %81 = vector.extract_strided_slice %62 {offsets = [0, 128], sizes = [8, 128], strides = [1, 1]} : vector<8x256xf32> to vector<8x128xf32>
      %82 = arith.subf %arg14, %76 : vector<8x128xf32>
      %83 = arith.mulf %81, %82 : vector<8x128xf32>
      %84 = arith.addf %76, %83 : vector<8x128xf32>
      %85 = vector.broadcast %35 : i32 to vector<8x1xi32>
      %86 = arith.cmpi slt, %85, %17 : vector<8x1xi32>
      %87 = vector.broadcast %36 : i32 to vector<8x1xi32>
      %88 = arith.cmpi slt, %87, %17 : vector<8x1xi32>
      %89 = vector.shape_cast %86 : vector<8x1xi1> to vector<8x1xi1>
      %90 = vector.broadcast %89 : vector<8x1xi1> to vector<8x128xi1>
      %91 = arith.select %90, %80, %arg13 : vector<8x128xi1>, vector<8x128xf32>
      %92 = vector.shape_cast %88 : vector<8x1xi1> to vector<8x1xi1>
      %93 = vector.broadcast %92 : vector<8x1xi1> to vector<8x128xi1>
      %94 = arith.select %93, %84, %arg14 : vector<8x128xi1>, vector<8x128xf32>
      %cst_38 = arith.constant 0.000000e+00 : f32
      %95 = vector.shape_cast %86 : vector<8x1xi1> to vector<8x1xi1>
      %96 = vector.broadcast %95 : vector<8x1xi1> to vector<8x128xi1>
      %97 = vector.broadcast %cst_38 : f32 to vector<8x128xf32>
      %98 = arith.select %96, %80, %97 : vector<8x128xi1>, vector<8x128xf32>
      %99 = arith.addf %arg15, %98 : vector<8x128xf32>
      %cst_39 = arith.constant 0.000000e+00 : f32
      %100 = vector.shape_cast %88 : vector<8x1xi1> to vector<8x1xi1>
      %101 = vector.broadcast %100 : vector<8x1xi1> to vector<8x128xi1>
      %102 = vector.broadcast %cst_39 : f32 to vector<8x128xf32>
      %103 = arith.select %101, %84, %102 : vector<8x128xi1>, vector<8x128xf32>
      %104 = arith.addf %99, %103 : vector<8x128xf32>
      %c7_i32_40 = arith.constant 7 : i32
      %105 = arith.subi %c7_i32_40, %34 : i32
      %106 = arith.index_cast %34 : i32 to index
      %c0_41 = arith.constant 0 : index
      %c0_42 = arith.constant 0 : index
      %107 = vector.load %arg10[%106, %c0_41, %c0_42] : memref<8x8x384xf32, #tpu.memory_space<vmem>>, vector<1x8x384xf32>
      %108 = vector.shape_cast %107 : vector<1x8x384xf32> to vector<8x384xf32>
      %109 = arith.index_cast %105 : i32 to index
      %c0_43 = arith.constant 0 : index
      %c0_44 = arith.constant 0 : index
      %110 = vector.load %arg11[%109, %c0_43, %c0_44] : memref<8x8x384xf32, #tpu.memory_space<vmem>>, vector<1x8x384xf32>
      %111 = vector.shape_cast %110 : vector<1x8x384xf32> to vector<8x384xf32>
      %c0_45 = arith.constant 0 : index
      %c0_46 = arith.constant 0 : index
      %112 = vector.load %arg4[%c0_45, %c0_46] : memref<128x384xf32, #tpu.memory_space<vmem>>, vector<128x384xf32>
      %cst_47 = arith.constant dense<0.000000e+00> : vector<8x384xf32>
      %113 = tpu.matmul %91, %112, %cst_47 {dimension_numbers = #tpu.dot_dimension_numbers<[1], [0], [0], [1], [0, 0, 1, 1], [], []>} : vector<8x128xf32>, vector<128x384xf32>, vector<8x384xf32> -> vector<8x384xf32>
      %c0_48 = arith.constant 0 : index
      %c0_49 = arith.constant 0 : index
      %114 = vector.load %arg5[%c0_48, %c0_49] : memref<128x384xf32, #tpu.memory_space<vmem>>, vector<128x384xf32>
      %cst_50 = arith.constant dense<0.000000e+00> : vector<8x384xf32>
      %115 = tpu.matmul %94, %114, %cst_50 {dimension_numbers = #tpu.dot_dimension_numbers<[1], [0], [0], [1], [0, 0, 1, 1], [], []>} : vector<8x128xf32>, vector<128x384xf32>, vector<8x384xf32> -> vector<8x384xf32>
      %116 = vector.extract_strided_slice %108 {offsets = [0, 0], sizes = [8, 256], strides = [1, 1]} : vector<8x384xf32> to vector<8x256xf32>
      %117 = vector.extract_strided_slice %113 {offsets = [0, 0], sizes = [8, 256], strides = [1, 1]} : vector<8x384xf32> to vector<8x256xf32>
      %118 = arith.addf %116, %117 : vector<8x256xf32>
      %119 = arith.negf %118 : vector<8x256xf32>
      %120 = math.exp %119 : vector<8x256xf32>
      %cst_51 = arith.constant 1.000000e+00 : f32
      %121 = vector.broadcast %cst_51 : f32 to vector<8x256xf32>
      %122 = arith.addf %121, %120 : vector<8x256xf32>
      %123 = arith.divf %121, %122 : vector<8x256xf32>
      %124 = vector.extract_strided_slice %111 {offsets = [0, 0], sizes = [8, 256], strides = [1, 1]} : vector<8x384xf32> to vector<8x256xf32>
      %125 = vector.extract_strided_slice %115 {offsets = [0, 0], sizes = [8, 256], strides = [1, 1]} : vector<8x384xf32> to vector<8x256xf32>
      %126 = arith.addf %124, %125 : vector<8x256xf32>
      %127 = arith.negf %126 : vector<8x256xf32>
      %128 = math.exp %127 : vector<8x256xf32>
      %cst_52 = arith.constant 1.000000e+00 : f32
      %129 = vector.broadcast %cst_52 : f32 to vector<8x256xf32>
      %130 = arith.addf %129, %128 : vector<8x256xf32>
      %131 = arith.divf %129, %130 : vector<8x256xf32>
      %132 = vector.extract_strided_slice %108 {offsets = [0, 256], sizes = [8, 128], strides = [1, 1]} : vector<8x384xf32> to vector<8x128xf32>
      %133 = vector.extract_strided_slice %123 {offsets = [0, 0], sizes = [8, 128], strides = [1, 1]} : vector<8x256xf32> to vector<8x128xf32>
      %134 = vector.extract_strided_slice %113 {offsets = [0, 256], sizes = [8, 128], strides = [1, 1]} : vector<8x384xf32> to vector<8x128xf32>
      %135 = arith.addf %134, %20 : vector<8x128xf32>
      %136 = arith.mulf %133, %135 : vector<8x128xf32>
      %137 = arith.addf %132, %136 : vector<8x128xf32>
      %138 = math.tanh %137 : vector<8x128xf32>
      %139 = vector.extract_strided_slice %111 {offsets = [0, 256], sizes = [8, 128], strides = [1, 1]} : vector<8x384xf32> to vector<8x128xf32>
      %140 = vector.extract_strided_slice %131 {offsets = [0, 0], sizes = [8, 128], strides = [1, 1]} : vector<8x256xf32> to vector<8x128xf32>
      %141 = vector.extract_strided_slice %115 {offsets = [0, 256], sizes = [8, 128], strides = [1, 1]} : vector<8x384xf32> to vector<8x128xf32>
      %142 = arith.addf %141, %23 : vector<8x128xf32>
      %143 = arith.mulf %140, %142 : vector<8x128xf32>
      %144 = arith.addf %139, %143 : vector<8x128xf32>
      %145 = math.tanh %144 : vector<8x128xf32>
      %146 = vector.extract_strided_slice %123 {offsets = [0, 128], sizes = [8, 128], strides = [1, 1]} : vector<8x256xf32> to vector<8x128xf32>
      %147 = arith.subf %91, %138 : vector<8x128xf32>
      %148 = arith.mulf %146, %147 : vector<8x128xf32>
      %149 = arith.addf %138, %148 : vector<8x128xf32>
      %150 = vector.extract_strided_slice %131 {offsets = [0, 128], sizes = [8, 128], strides = [1, 1]} : vector<8x256xf32> to vector<8x128xf32>
      %151 = arith.subf %94, %145 : vector<8x128xf32>
      %152 = arith.mulf %150, %151 : vector<8x128xf32>
      %153 = arith.addf %145, %152 : vector<8x128xf32>
      %154 = vector.broadcast %34 : i32 to vector<8x1xi32>
      %155 = arith.cmpi slt, %154, %17 : vector<8x1xi32>
      %156 = vector.broadcast %105 : i32 to vector<8x1xi32>
      %157 = arith.cmpi slt, %156, %17 : vector<8x1xi32>
      %158 = vector.shape_cast %155 : vector<8x1xi1> to vector<8x1xi1>
      %159 = vector.broadcast %158 : vector<8x1xi1> to vector<8x128xi1>
      %160 = arith.select %159, %149, %91 : vector<8x128xi1>, vector<8x128xf32>
      %161 = vector.shape_cast %157 : vector<8x1xi1> to vector<8x1xi1>
      %162 = vector.broadcast %161 : vector<8x1xi1> to vector<8x128xi1>
      %163 = arith.select %162, %153, %94 : vector<8x128xi1>, vector<8x128xf32>
      %cst_53 = arith.constant 0.000000e+00 : f32
      %164 = vector.shape_cast %155 : vector<8x1xi1> to vector<8x1xi1>
      %165 = vector.broadcast %164 : vector<8x1xi1> to vector<8x128xi1>
      %166 = vector.broadcast %cst_53 : f32 to vector<8x128xf32>
      %167 = arith.select %165, %149, %166 : vector<8x128xi1>, vector<8x128xf32>
      %168 = arith.addf %104, %167 : vector<8x128xf32>
      %cst_54 = arith.constant 0.000000e+00 : f32
      %169 = vector.shape_cast %157 : vector<8x1xi1> to vector<8x1xi1>
      %170 = vector.broadcast %169 : vector<8x1xi1> to vector<8x128xi1>
      %171 = vector.broadcast %cst_54 : f32 to vector<8x128xf32>
      %172 = arith.select %170, %153, %171 : vector<8x128xi1>, vector<8x128xf32>
      %173 = arith.addf %168, %172 : vector<8x128xf32>
      scf.yield %160, %163, %173 : vector<8x128xf32>, vector<8x128xf32>, vector<8x128xf32>
    }
    %c4_i32_20 = arith.constant 4 : i32
    %27 = arith.sitofp %17 : vector<8x1xi32> to vector<8x1xf32>
    %cst_21 = arith.constant 1.000000e+00 : f32
    %28 = vector.broadcast %cst_21 : f32 to vector<8x1xf32>
    %29 = arith.maximumf %27, %28 : vector<8x1xf32>
    %30 = vector.broadcast %29 : vector<8x1xf32> to vector<8x128xf32>
    %31 = arith.divf %26#2, %30 : vector<8x128xf32>
    %c0_22 = arith.constant 0 : index
    %c0_23 = arith.constant 0 : index
    %32 = vector.load %arg9[%c0_22, %c0_23] : memref<8x128xf32, #tpu.memory_space<vmem>>, vector<8x128xf32>
    tpu.vector_store %arg9[%c0_22, %c0_23], %31 {strides = array<i32>} : memref<8x128xf32, #tpu.memory_space<vmem>>, vector<8x128xf32>,
    return
  }
  func.func @transform_0(%arg0: i32) -> (i32, i32, i32) {
    %c0_i32 = arith.constant 0 : i32
    %c0_i32_0 = arith.constant 0 : i32
    %c0_i32_1 = arith.constant 0 : i32
    return %c0_i32, %arg0, %c0_i32_0 : i32, i32, i32
  }
  func.func @transform_1(%arg0: i32) -> (i32, i32) {
    %c0_i32 = arith.constant 0 : i32
    %c0_i32_0 = arith.constant 0 : i32
    return %arg0, %c0_i32 : i32, i32
  }
  func.func @transform_2(%arg0: i32) -> (i32, i32) {
    %c0_i32 = arith.constant 0 : i32
    %c0_i32_0 = arith.constant 0 : i32
    %c0_i32_1 = arith.constant 0 : i32
    return %c0_i32, %c0_i32_0 : i32, i32
  }
  func.func @transform_3(%arg0: i32) -> (i32, i32) {
    %c0_i32 = arith.constant 0 : i32
    %c0_i32_0 = arith.constant 0 : i32
    %c0_i32_1 = arith.constant 0 : i32
    return %c0_i32, %c0_i32_0 : i32, i32
  }
  func.func @transform_4(%arg0: i32) -> (i32, i32) {
    %c0_i32 = arith.constant 0 : i32
    %c0_i32_0 = arith.constant 0 : i32
    %c0_i32_1 = arith.constant 0 : i32
    return %c0_i32, %c0_i32_0 : i32, i32
  }
  func.func @transform_5(%arg0: i32) -> (i32, i32) {
    %c0_i32 = arith.constant 0 : i32
    %c0_i32_0 = arith.constant 0 : i32
    %c0_i32_1 = arith.constant 0 : i32
    return %c0_i32, %c0_i32_0 : i32, i32
  }
  func.func @transform_6(%arg0: i32) -> (i32, i32) {
    %c0_i32 = arith.constant 0 : i32
    %c0_i32_0 = arith.constant 0 : i32
    %c0_i32_1 = arith.constant 0 : i32
    return %c0_i32, %c0_i32_0 : i32, i32
  }
  func.func @transform_7(%arg0: i32) -> (i32, i32) {
    %c0_i32 = arith.constant 0 : i32
    %c0_i32_0 = arith.constant 0 : i32
    %c0_i32_1 = arith.constant 0 : i32
    return %c0_i32, %c0_i32_0 : i32, i32
  }
  func.func @transform_8(%arg0: i32) -> (i32, i32) {
    %c0_i32 = arith.constant 0 : i32
    %c0_i32_0 = arith.constant 0 : i32
    return %arg0, %c0_i32 : i32, i32
  }
}

</mosaic_0001>

<bundles_post_ra>
// kernel: encoder_rnn_avg.1
= control target key start
LH: loop header
LB: loop body
LE: loop exit
PB: predicated region body
PF: predicated region fallthrough
CT: control target
= control target key end

     0   :  { %13 = vsyncpa [#allocation5], 0  ;;  %v2294_v1 = vmov 0   ;;  %s3245_s0 = inlined_call_operand.vmem [shape: f32[8,8,128], index: 0, kind: input, shape index: {}]   ;;  %s3246_s1 = inlined_call_operand.vmem [shape: s32[8,1], index: 1, kind: input, shape index: {}]   ;;  %s3247_s2 = inlined_call_operand.vmem [shape: bf16[128,768], index: 2, kind: input, shape index: {}]   ;;  %s3248_s3 = inlined_call_operand.vmem [shape: f32[128,384], index: 3, kind: input, shape index: {}]   ;;  %s3249_s4 = inlined_call_operand.vmem [shape: f32[128,384], index: 4, kind: input, shape index: {}]   ;;  %s3250_s5 = inlined_call_operand.vmem [shape: f32[1,768], index: 5, kind: input, shape index: {}]   ;;  %s3251_s6 = inlined_call_operand.vmem [shape: f32[1,128], index: 6, kind: input, shape index: {}]   ;;  %s3252_s7 = inlined_call_operand.vmem [shape: f32[1,128], index: 7, kind: input, shape index: {}]   ;;  %s3253_s8 = inlined_call_operand.hbm [shape: f32[8,128], index: 8, kind: output, shape index: {}]  }
   0x1   :  { %v2121_v0 = vld [vmem:[%s3247_s2 + $0x4] ss:$24 sps:$4 sm:$0xff]   ;;  %363 = vmatprep.mubr.bf16.mxu0 %v2294_v1  ;;  %436 = vmatprep.mubr.bf16.mxu1 %v2294_v1  ;;  %v2125_v3 = vld [vmem:[%s3247_s2] ss:$24 sps:$4 sm:$0xff]   ;;  %v2127_v5 = vld [vmem:[%s3247_s2 + $0x34] ss:$24 sps:$4 sm:$0xff]  }
   0x2   :  { %v2123_v2 = vld [vmem:[%s3247_s2 + $0xc] ss:$24 sps:$4 sm:$0xff]   ;;  %v2126_v4 = vld [vmem:[%s3247_s2 + $0x8] ss:$24 sps:$4 sm:$0xff]   ;;  %331 = vmatprep.subr.bf16.mxu0 %v2121_v0  ;;  %v2129_v6 = vld [vmem:[%s3247_s2 + $0x3c] ss:$24 sps:$4 sm:$0xff]   ;;  %v552_v0 = vlaneseq }
   0x3   :  { %404 = vmatprep.subr.bf16.mxu1 %v2123_v2  ;;  %332 = vmatpush1.bf16.msra.mxu0 %v2125_v3  ;;  %v2131_v7 = vld [vmem:[%s3247_s2 + $0x30] ss:$24 sps:$4 sm:$0xff]   ;;  %v2133_v9 = vld [vmem:[%s3247_s2 + $0x64] ss:$24 sps:$4 sm:$0xff]   ;;  %v2137_v11 = vld [vmem:[%s3247_s2 + $0x60] ss:$24 sps:$4 sm:$0xff]  }
   0x4   :  { %405 = vmatpush1.bf16.msra.mxu1 %v2126_v4  ;;  %333 = vmatprep.subr.bf16.mxu0 %v2127_v5  ;;  %v2132_v8 = vld [vmem:[%s3247_s2 + $0x38] ss:$24 sps:$4 sm:$0xff]   ;;  %v2135_v10 = vld [vmem:[%s3247_s2 + $0x6c] ss:$24 sps:$4 sm:$0xff]   ;;  %v2138_v12 = vld [vmem:[%s3247_s2 + $0x68] ss:$24 sps:$4 sm:$0xff]  }
   0x5   :  { %406 = vmatprep.subr.bf16.mxu1 %v2129_v6  ;;  %v2139_v13 = vld [vmem:[%s3247_s2 + $0x94] ss:$24 sps:$4 sm:$0xff]   ;;  %v2143_v15 = vld [vmem:[%s3247_s2 + $0x90] ss:$24 sps:$4 sm:$0xff]   ;;  %v2145_v17 = vld [vmem:[%s3247_s2 + $0xc4] ss:$24 sps:$4 sm:$0xff]  }
   0x6   :  { %v2141_v14 = vld [vmem:[%s3247_s2 + $0x9c] ss:$24 sps:$4 sm:$0xff]   ;;  %v2144_v16 = vld [vmem:[%s3247_s2 + $0x98] ss:$24 sps:$4 sm:$0xff]   ;;  %v2147_v18 = vld [vmem:[%s3247_s2 + $0xcc] ss:$24 sps:$4 sm:$0xff]  }
   0x7   :  { %334 = vmatpush1.bf16.msra.mxu0 %v2131_v7  ;;  %v2149_v19 = vld [vmem:[%s3247_s2 + $0xc0] ss:$24 sps:$4 sm:$0xff]   ;;  %v2151_v21 = vld [vmem:[%s3247_s2 + $0xf4] ss:$24 sps:$4 sm:$0xff]   ;;  %v2155_v23 = vld [vmem:[%s3247_s2 + $0xf0] ss:$24 sps:$4 sm:$0xff]  }
   0x8   :  { %407 = vmatpush1.bf16.msra.mxu1 %v2132_v8  ;;  %335 = vmatprep.subr.bf16.mxu0 %v2133_v9  ;;  %v2150_v20 = vld [vmem:[%s3247_s2 + $0xc8] ss:$24 sps:$4 sm:$0xff]   ;;  %v2153_v22 = vld [vmem:[%s3247_s2 + $0xfc] ss:$24 sps:$4 sm:$0xff]   ;;  %v2156_v24 = vld [vmem:[%s3247_s2 + $0xf8] ss:$24 sps:$4 sm:$0xff]  }
   0x9   :  { %408 = vmatprep.subr.bf16.mxu1 %v2135_v10  ;;  %v2157_v25 = vld [vmem:[%s3247_s2 + $0x124] ss:$24 sps:$4 sm:$0xff]   ;;  %v2161_v27 = vld [vmem:[%s3247_s2 + $0x120] ss:$24 sps:$4 sm:$0xff]   ;;  %v2163_v29 = vld [vmem:[%s3247_s2 + $0x154] ss:$24 sps:$4 sm:$0xff]  }
   0xa   :  { %v2159_v26 = vld [vmem:[%s3247_s2 + $0x12c] ss:$24 sps:$4 sm:$0xff]   ;;  %v2162_v28 = vld [vmem:[%s3247_s2 + $0x128] ss:$24 sps:$4 sm:$0xff]   ;;  %v2165_v30 = vld [vmem:[%s3247_s2 + $0x15c] ss:$24 sps:$4 sm:$0xff]  }
   0xb   :  { %336 = vmatpush1.bf16.msra.mxu0 %v2137_v11  ;;  %v2167_v31 = vld [vmem:[%s3247_s2 + $0x150] ss:$24 sps:$4 sm:$0xff]   ;;  %v31_v33 = vld [vmem:[%s3245_s0] sm:$0xff]  ;;  %v2171_v35 = vld [vmem:[%s3247_s2 + $0x14] ss:$24 sps:$4 sm:$0xff]   ;;  %v2545_v2 = vshrl.u32 %v552_v0, 7 }
   0xc   :  { %409 = vmatpush1.bf16.msra.mxu1 %v2138_v12  ;;  %337 = vmatprep.subr.bf16.mxu0 %v2139_v13  ;;  %v2168_v32 = vld [vmem:[%s3247_s2 + $0x158] ss:$24 sps:$4 sm:$0xff]   ;;  %v32_v34 = vld [vmem:[%s3245_s0 + $0x8] sm:$0xff]  ;;  %v2174_v38 = vld [vmem:[%s3247_s2 + $0x44] ss:$24 sps:$4 sm:$0xff]  }
   0xd   :  { %410 = vmatprep.subr.bf16.mxu1 %v2141_v14  ;;  %v2452_v36 = vpack.c.bf16 %v32_v34, %v31_v33  ;;  %v2169_v37 = vld [vmem:[%s3247_s2 + $0x10] ss:$24 sps:$4 sm:$0xff]   ;;  %v2172_v39 = vld [vmem:[%s3247_s2 + $0x40] ss:$24 sps:$4 sm:$0xff]   ;;  %v2177_v42 = vld [vmem:[%s3247_s2 + $0x74] ss:$24 sps:$4 sm:$0xff]  }
   0xe   :  { %v33_v40 = vld [vmem:[%s3245_s0 + $0x10] sm:$0xff]  ;;  %v34_v41 = vld [vmem:[%s3245_s0 + $0x18] sm:$0xff]  ;;  %v35_v47 = vld [vmem:[%s3245_s0 + $0x20] sm:$0xff]  ;;  %v554_v3 = vsub.s32 0, %v2545_v2  ;;  %v562_v5 = vsub.s32 2, %v2545_v2  ;;  %v558_v6 = vsub.s32 1, %v2545_v2 }
   0xf   :  { %338 = vmatpush1.bf16.msra.mxu0 %v2143_v15  ;;  %v40_v43 = vpack.c.bf16 %v34_v41, %v33_v40  ;;  %v2175_v44 = vld [vmem:[%s3247_s2 + $0x70] ss:$24 sps:$4 sm:$0xff]   ;;  %v2180_v45 = vld [vmem:[%s3247_s2 + $0xa4] ss:$24 sps:$4 sm:$0xff]   ;;  %v2178_v46 = vld [vmem:[%s3247_s2 + $0xa0] ss:$24 sps:$4 sm:$0xff]  }
  0x10   :  { %411 = vmatpush1.bf16.msra.mxu1 %v2144_v16  ;;  %339 = vmatprep.subr.bf16.mxu0 %v2145_v17  ;;  %v36_v48 = vld [vmem:[%s3245_s0 + $0x28] sm:$0xff]  ;;  %v2186_v52 = vld [vmem:[%s3247_s2 + $0x104] ss:$24 sps:$4 sm:$0xff]   ;;  %v2184_v53 = vld [vmem:[%s3247_s2 + $0x100] ss:$24 sps:$4 sm:$0xff]  }
  0x11   :  { %412 = vmatprep.subr.bf16.mxu1 %v2147_v18  ;;  %v2183_v49 = vld [vmem:[%s3247_s2 + $0xd4] ss:$24 sps:$4 sm:$0xff]   ;;  %v41_v50 = vpack.c.bf16 %v36_v48, %v35_v47  ;;  %v2181_v51 = vld [vmem:[%s3247_s2 + $0xd0] ss:$24 sps:$4 sm:$0xff]   ;;  %v38_v55 = vld [vmem:[%s3245_s0 + $0x38] sm:$0xff] }
  0x12   :  { %v37_v54 = vld [vmem:[%s3245_s0 + $0x30] sm:$0xff]  ;;  %v2192_v59 = vld [vmem:[%s3247_s2 + $0x164] ss:$24 sps:$4 sm:$0xff]   ;;  %v2190_v60 = vld [vmem:[%s3247_s2 + $0x160] ss:$24 sps:$4 sm:$0xff]  }
  0x13   :  { %340 = vmatpush1.bf16.msra.mxu0 %v2149_v19  ;;  %v2189_v56 = vld [vmem:[%s3247_s2 + $0x134] ss:$24 sps:$4 sm:$0xff]   ;;  %v42_v57 = vpack.c.bf16 %v38_v55, %v37_v54  ;;  %v2187_v58 = vld [vmem:[%s3247_s2 + $0x130] ss:$24 sps:$4 sm:$0xff]   ;;  %v2533_v61 = vld [vmem:[%s3246_s1] sm:$0xff] }
  0x14   :  { %413 = vmatpush1.bf16.msra.mxu1 %v2150_v20  ;;  %341 = vmatprep.subr.bf16.mxu0 %v2151_v21  ;;  %v2538_v62 = vld [vmem:[%s3251_s6] ss:$0 sm:$0xff]  ;;  %v2556_v7 = vld [vmem:[%s3250_s5 + $0x3] sm:$0x7] }
  0x15   :  { %414 = vmatprep.subr.bf16.mxu1 %v2153_v22  ;;  %v2543_v63 = vld [vmem:[%s3252_s7] ss:$0 sm:$0xff]  ;;  %v2569_v11 = vrot.slane %v2556_v7, %v554_v3 }
  0x16   :  { %v550_v4 = vld [vmem:[%s3250_s5] sm:$0x7]  ;;  %s2615_s5 = smov 0  }
  0x17   :  { %342 = vmatpush1.bf16.msra.mxu0 %v2155_v23  ;;  %v2558_v8 = vrot.slane %v550_v4, %v554_v3  ;;  %v2562_v9 = vrot.slane %v550_v4, %v562_v5  ;;  %v2566_v10 = vrot.slane %v550_v4, %v558_v6 }
  0x18   :  { %415 = vmatpush1.bf16.msra.mxu1 %v2156_v24  ;;  %343 = vmatprep.subr.bf16.mxu0 %v2157_v25 }
  0x19   :  { %416 = vmatprep.subr.bf16.mxu1 %v2159_v26 }
  0x1b   :  { %344 = vmatpush1.bf16.msra.mxu0 %v2161_v27 }
  0x1c   :  { %417 = vmatpush1.bf16.msra.mxu1 %v2162_v28  ;;  %345 = vmatprep.subr.bf16.mxu0 %v2163_v29 }
  0x1d   :  { %418 = vmatprep.subr.bf16.mxu1 %v2165_v30 }
  0x1f   :  { %346 = vmatpush1.bf16.msra.mxu0 %v2167_v31 }
  0x20   :  { %419 = vmatpush1.bf16.msra.mxu1 %v2168_v32  ;;  %477 = vmatprep.subr.bf16.mxu0 %v2171_v35 }
  0x21   :  { %2067 = vmatprep.subr.bf16.mxu1 %v2171_v35 }
  0x22   :  { %364 = vmatmul.mubr.bf16.vlgmr.msra.gmra.mrb[0].mxu0 %v2452_v36 }
  0x23   :  { %437 = vmatmul.mubr.bf16.vlgmr.msra.gmra.mrb[0].mxu1 %v2452_v36  ;;  %478 = vmatpush1.bf16.msra.mxu0 %v2169_v37 }
  0x24   :  { %2075 = vmatpush1.bf16.msra.mxu1 %v2169_v37  ;;  %479 = vmatprep.subr.bf16.mxu0 %v2174_v38 }
  0x25   :  { %2068 = vmatprep.subr.bf16.mxu1 %v2174_v38  ;;  %373 = vmatprep.mubr.bf16.mxu0 %v2294_v1 }
  0x26   :  { %446 = vmatprep.mubr.bf16.mxu1 %v2294_v1 }
  0x27   :  { %480 = vmatpush1.bf16.msra.mxu0 %v2172_v39 }
  0x28   :  { %2076 = vmatpush1.bf16.msra.mxu1 %v2172_v39  ;;  %481 = vmatprep.subr.bf16.mxu0 %v2177_v42 }
  0x29   :  { %2069 = vmatprep.subr.bf16.mxu1 %v2177_v42 }
  0x2a   :  { %374 = vmatmul.mubr.bf16.gmra.mrb[4].mxu0 %v40_v43 }
  0x2b   :  { %447 = vmatmul.mubr.bf16.gmra.mrb[4].mxu1 %v40_v43  ;;  %482 = vmatpush1.bf16.msra.mxu0 %v2175_v44 }
  0x2c   :  { %2077 = vmatpush1.bf16.msra.mxu1 %v2175_v44  ;;  %483 = vmatprep.subr.bf16.mxu0 %v2180_v45 }
  0x2d   :  { %2070 = vmatprep.subr.bf16.mxu1 %v2180_v45  ;;  %383 = vmatprep.mubr.bf16.mxu0 %v2294_v1 }
  0x2e   :  { %456 = vmatprep.mubr.bf16.mxu1 %v2294_v1 }
  0x2f   :  { %484 = vmatpush1.bf16.msra.mxu0 %v2178_v46 }
  0x30   :  { %2078 = vmatpush1.bf16.msra.mxu1 %v2178_v46  ;;  %485 = vmatprep.subr.bf16.mxu0 %v2183_v49 }
  0x31   :  { %2071 = vmatprep.subr.bf16.mxu1 %v2183_v49 }
  0x32   :  { %384 = vmatmul.mubr.bf16.gmra.mrb[8].mxu0 %v41_v50 }
  0x33   :  { %457 = vmatmul.mubr.bf16.gmra.mrb[8].mxu1 %v41_v50  ;;  %486 = vmatpush1.bf16.msra.mxu0 %v2181_v51 }
  0x34   :  { %2079 = vmatpush1.bf16.msra.mxu1 %v2181_v51  ;;  %487 = vmatprep.subr.bf16.mxu0 %v2186_v52 }
  0x35   :  { %2072 = vmatprep.subr.bf16.mxu1 %v2186_v52  ;;  %393 = vmatprep.mubr.bf16.mxu0 %v2294_v1 }
  0x36   :  { %466 = vmatprep.mubr.bf16.mxu1 %v2294_v1 }
  0x37   :  { %488 = vmatpush1.bf16.msra.mxu0 %v2184_v53 }
  0x38   :  { %2080 = vmatpush1.bf16.msra.mxu1 %v2184_v53  ;;  %489 = vmatprep.subr.bf16.mxu0 %v2189_v56 }
  0x39   :  { %2073 = vmatprep.subr.bf16.mxu1 %v2189_v56 }
  0x3a   :  { %394 = vmatmul.mubr.bf16.gmra.mrb[12].mxu0 %v42_v57 }
  0x3b   :  { %467 = vmatmul.mubr.bf16.gmra.mrb[12].mxu1 %v42_v57  ;;  %490 = vmatpush1.bf16.msra.mxu0 %v2187_v58 }
  0x3c   :  { %2081 = vmatpush1.bf16.msra.mxu1 %v2187_v58  ;;  %491 = vmatprep.subr.bf16.mxu0 %v2192_v59 }
  0x3d   :  { %2074 = vmatprep.subr.bf16.mxu1 %v2192_v59  ;;  %509 = vmatprep.mubr.bf16.mxu0 %v2294_v1 }
  0x3e   :  { %529 = vmatprep.mubr.bf16.mxu1 %v2294_v1 }
  0x3f   :  { %492 = vmatpush1.bf16.msra.mxu0 %v2190_v60 }
  0x40   :  { %2082 = vmatpush1.bf16.msra.mxu1 %v2190_v60 }
  0x42   :  { %510 = vmatmul.mubr.bf16.vlgmr.msra.gmra.mrb[16].mxu0 %v2452_v36 }
  0x43   :  { %530 = vmatmul.mubr.bf16.vlgmr.msra.gmra.mrb[16].mxu1 %v41_v50  ;;  %519 = vmatprep.mubr.bf16.mxu0 %v2294_v1 }
  0x44   :  { %539 = vmatprep.mubr.bf16.mxu1 %v2294_v1 }
  0x4a   :  { %520 = vmatmul.mubr.bf16.gmra.mrb[20].mxu0 %v40_v43 }
  0x4b   :  { %540 = vmatmul.mubr.bf16.gmra.mrb[20].mxu1 %v42_v57 }
  0xf5   :  { %v365_v12 = vpop.f32.mrb[0].mxu0 }
  0xf6   :  { %v567_v13 = vadd.f32 %v2558_v8, %v365_v12  ;;  %v438_v14 = vpop.f32.mrb[0].mxu1  ;;  %v367_v15 = vpop.f32.mrb[1].mxu0 }
  0xf7   :  { %v569_v16 = vadd.f32 %v2562_v9, %v438_v14  ;;  %v568_v17 = vadd.f32 %v2566_v10, %v367_v15  ;;  %v440_v18 = vpop.f32.mrb[1].mxu1  ;;  %v369_v19 = vpop.f32.mrb[2].mxu0 }
  0xf8   :  { %591 = vst [vmem:[#allocation2] sm:$0xff] %v567_v13  ;;  %v632_v20 = vadd.f32 %v2569_v11, %v440_v18  ;;  %v570_v21 = vadd.f32 %v2558_v8, %v369_v19  ;;  %v442_v22 = vpop.f32.mrb[2].mxu1  ;;  %v371_v23 = vpop.f32.mrb[3].mxu0 }
  0xf9   :  { %593 = vst [vmem:[#allocation2 + $0x10] sm:$0xff] %v569_v16  ;;  %592 = vst [vmem:[#allocation2 + $0x8] sm:$0xff] %v568_v17  ;;  %v572_v24 = vadd.f32 %v2562_v9, %v442_v22  ;;  %v571_v25 = vadd.f32 %v2566_v10, %v371_v23  ;;  %v444_v26 = vpop.f32.mrb[3].mxu1 }
  0xfa   :  { %656 = vst [vmem:[#allocation3] sm:$0xff] %v632_v20  ;;  %594 = vst [vmem:[#allocation2 + $0x18] sm:$0xff] %v570_v21  ;;  %v635_v27 = vadd.f32 %v2569_v11, %v444_v26 }
  0xfb   :  { %596 = vst [vmem:[#allocation2 + $0x28] sm:$0xff] %v572_v24  ;;  %595 = vst [vmem:[#allocation2 + $0x20] sm:$0xff] %v571_v25  ;;  %v624_v24 = vrot.slane %v2556_v7, %v558_v6 }
  0xfc   :  { %659 = vst [vmem:[#allocation3 + $0x18] sm:$0xff] %v635_v27 }
  0xfd   :  { %v375_v28 = vpop.f32.mrb[4].mxu0 }
  0xfe   :  { %v573_v29 = vadd.f32 %v2558_v8, %v375_v28  ;;  %v448_v30 = vpop.f32.mrb[4].mxu1  ;;  %v377_v31 = vpop.f32.mrb[5].mxu0 }
  0xff   :  { %v575_v32 = vadd.f32 %v2562_v9, %v448_v30  ;;  %v574_v33 = vadd.f32 %v2566_v10, %v377_v31  ;;  %v450_v34 = vpop.f32.mrb[5].mxu1  ;;  %v379_v35 = vpop.f32.mrb[6].mxu0 }
 0x100   :  { %597 = vst [vmem:[#allocation2 + $0x30] sm:$0xff] %v573_v29  ;;  %v638_v36 = vadd.f32 %v2569_v11, %v450_v34  ;;  %v576_v37 = vadd.f32 %v2558_v8, %v379_v35  ;;  %v452_v38 = vpop.f32.mrb[6].mxu1  ;;  %v381_v39 = vpop.f32.mrb[7].mxu0 }
 0x101   :  { %599 = vst [vmem:[#allocation2 + $0x40] sm:$0xff] %v575_v32  ;;  %598 = vst [vmem:[#allocation2 + $0x38] sm:$0xff] %v574_v33  ;;  %v578_v40 = vadd.f32 %v2562_v9, %v452_v38  ;;  %v577_v41 = vadd.f32 %v2566_v10, %v381_v39  ;;  %v454_v42 = vpop.f32.mrb[7].mxu1 }
 0x102   :  { %662 = vst [vmem:[#allocation3 + $0x30] sm:$0xff] %v638_v36  ;;  %600 = vst [vmem:[#allocation2 + $0x48] sm:$0xff] %v576_v37  ;;  %v641_v43 = vadd.f32 %v2569_v11, %v454_v42 }
 0x103   :  { %602 = vst [vmem:[#allocation2 + $0x58] sm:$0xff] %v578_v40  ;;  %601 = vst [vmem:[#allocation2 + $0x50] sm:$0xff] %v577_v41 }
 0x104   :  { %665 = vst [vmem:[#allocation3 + $0x48] sm:$0xff] %v641_v43 }
 0x105   :  { %v385_v44 = vpop.f32.mrb[8].mxu0 }
 0x106   :  { %v579_v45 = vadd.f32 %v2558_v8, %v385_v44  ;;  %v458_v46 = vpop.f32.mrb[8].mxu1  ;;  %v387_v47 = vpop.f32.mrb[9].mxu0 }
 0x107   :  { %v581_v48 = vadd.f32 %v2562_v9, %v458_v46  ;;  %v580_v49 = vadd.f32 %v2566_v10, %v387_v47  ;;  %v460_v50 = vpop.f32.mrb[9].mxu1  ;;  %v389_v51 = vpop.f32.mrb[10].mxu0 }
 0x108   :  { %603 = vst [vmem:[#allocation2 + $0x60] sm:$0xff] %v579_v45  ;;  %v644_v52 = vadd.f32 %v2569_v11, %v460_v50  ;;  %v582_v53 = vadd.f32 %v2558_v8, %v389_v51  ;;  %v462_v54 = vpop.f32.mrb[10].mxu1  ;;  %v391_v55 = vpop.f32.mrb[11].mxu0  ;;  %v2609_v50 = vmov 0.0   ;;  %v2611_v51 = vmov 0.0  }
 0x109   :  { %605 = vst [vmem:[#allocation2 + $0x70] sm:$0xff] %v581_v48  ;;  %604 = vst [vmem:[#allocation2 + $0x68] sm:$0xff] %v580_v49  ;;  %v584_v56 = vadd.f32 %v2562_v9, %v462_v54  ;;  %v583_v57 = vadd.f32 %v2566_v10, %v391_v55  ;;  %v464_v58 = vpop.f32.mrb[11].mxu1 }
 0x10a   :  { %668 = vst [vmem:[#allocation3 + $0x60] sm:$0xff] %v644_v52  ;;  %606 = vst [vmem:[#allocation2 + $0x78] sm:$0xff] %v582_v53  ;;  %v647_v59 = vadd.f32 %v2569_v11, %v464_v58  ;;  %v2613_v52 = vmov 0.0  }
 0x10b   :  { %608 = vst [vmem:[#allocation2 + $0x88] sm:$0xff] %v584_v56  ;;  %607 = vst [vmem:[#allocation2 + $0x80] sm:$0xff] %v583_v57 }
 0x10c   :  { %671 = vst [vmem:[#allocation3 + $0x78] sm:$0xff] %v647_v59 }
 0x10d   :  { %v395_v60 = vpop.f32.mrb[12].mxu0 }
 0x10e   :  { %v585_v0 = vadd.f32 %v2558_v8, %v395_v60  ;;  %v468_v3 = vpop.f32.mrb[12].mxu1  ;;  %v397_v4 = vpop.f32.mrb[13].mxu0 }
 0x10f   :  { %v587_v12 = vadd.f32 %v2562_v9, %v468_v3  ;;  %v586_v13 = vadd.f32 %v2566_v10, %v397_v4  ;;  %v470_v14 = vpop.f32.mrb[13].mxu1  ;;  %v399_v15 = vpop.f32.mrb[14].mxu0 }
 0x110   :  { %609 = vst [vmem:[#allocation2 + $0x90] sm:$0xff] %v585_v0  ;;  %v650_v16 = vadd.f32 %v2569_v11, %v470_v14  ;;  %v588_v17 = vadd.f32 %v2558_v8, %v399_v15  ;;  %v472_v18 = vpop.f32.mrb[14].mxu1  ;;  %v401_v19 = vpop.f32.mrb[15].mxu0  ;;  %v628_v8 = vrot.slane %v2556_v7, %v562_v5 }
 0x111   :  { %611 = vst [vmem:[#allocation2 + $0xa0] sm:$0xff] %v587_v12  ;;  %610 = vst [vmem:[#allocation2 + $0x98] sm:$0xff] %v586_v13  ;;  %v590_v20 = vadd.f32 %v2562_v9, %v472_v18  ;;  %v589_v21 = vadd.f32 %v2566_v10, %v401_v19  ;;  %v474_v22 = vpop.f32.mrb[15].mxu1 }
 0x112   :  { %674 = vst [vmem:[#allocation3 + $0x90] sm:$0xff] %v650_v16  ;;  %612 = vst [vmem:[#allocation2 + $0xa8] sm:$0xff] %v588_v17  ;;  %v653_v23 = vadd.f32 %v2569_v11, %v474_v22 }
 0x113   :  { %614 = vst [vmem:[#allocation2 + $0xb8] sm:$0xff] %v590_v20  ;;  %613 = vst [vmem:[#allocation2 + $0xb0] sm:$0xff] %v589_v21 }
 0x114   :  { %677 = vst [vmem:[#allocation3 + $0xa8] sm:$0xff] %v653_v23 }
 0x115   :  { %v511_v25 = vpop.f32.mrb[16].mxu0 }
 0x116   :  { %v633_v9 = vadd.f32 %v624_v24, %v511_v25  ;;  %v531_v26 = vpop.f32.mrb[16].mxu1  ;;  %v513_v10 = vpop.f32.mrb[17].mxu0 }
 0x117   :  { %v645_v27 = vadd.f32 %v624_v24, %v531_v26  ;;  %v634_v28 = vadd.f32 %v628_v8, %v513_v10  ;;  %v533_v29 = vpop.f32.mrb[17].mxu1  ;;  %v515_v30 = vpop.f32.mrb[18].mxu0 }
 0x118   :  { %657 = vst [vmem:[#allocation3 + $0x8] sm:$0xff] %v633_v9  ;;  %v646_v11 = vadd.f32 %v628_v8, %v533_v29  ;;  %v636_v31 = vadd.f32 %v624_v24, %v515_v30  ;;  %v535_v32 = vpop.f32.mrb[18].mxu1  ;;  %v517_v6 = vpop.f32.mrb[19].mxu0 }
 0x119   :  { %669 = vst [vmem:[#allocation3 + $0x68] sm:$0xff] %v645_v27  ;;  %658 = vst [vmem:[#allocation3 + $0x10] sm:$0xff] %v634_v28  ;;  %v648_v33 = vadd.f32 %v624_v24, %v535_v32  ;;  %v637_v2 = vadd.f32 %v628_v8, %v517_v6  ;;  %v537_v34 = vpop.f32.mrb[19].mxu1 }
 0x11a   :  { %670 = vst [vmem:[#allocation3 + $0x70] sm:$0xff] %v646_v11  ;;  %660 = vst [vmem:[#allocation3 + $0x20] sm:$0xff] %v636_v31  ;;  %v649_v5 = vadd.f32 %v628_v8, %v537_v34 }
 0x11b   :  { %672 = vst [vmem:[#allocation3 + $0x80] sm:$0xff] %v648_v33  ;;  %661 = vst [vmem:[#allocation3 + $0x28] sm:$0xff] %v637_v2 }
 0x11c   :  { %673 = vst [vmem:[#allocation3 + $0x88] sm:$0xff] %v649_v5 }
 0x11d   :  { %v521_v7 = vpop.f32.mrb[20].mxu0 }
 0x11e   :  { %v639_v35 = vadd.f32 %v624_v24, %v521_v7  ;;  %v541_v36 = vpop.f32.mrb[20].mxu1  ;;  %v523_v37 = vpop.f32.mrb[21].mxu0 }
 0x11f   :  { %v651_v38 = vadd.f32 %v624_v24, %v541_v36  ;;  %v640_v39 = vadd.f32 %v628_v8, %v523_v37  ;;  %v543_v40 = vpop.f32.mrb[21].mxu1  ;;  %v525_v41 = vpop.f32.mrb[22].mxu0 }
 0x120   :  { %663 = vst [vmem:[#allocation3 + $0x38] sm:$0xff] %v639_v35  ;;  %v652_v42 = vadd.f32 %v628_v8, %v543_v40  ;;  %v642_v43 = vadd.f32 %v624_v24, %v525_v41  ;;  %v545_v44 = vpop.f32.mrb[22].mxu1  ;;  %v527_v45 = vpop.f32.mrb[23].mxu0 }
 0x121   :  { %675 = vst [vmem:[#allocation3 + $0x98] sm:$0xff] %v651_v38  ;;  %664 = vst [vmem:[#allocation3 + $0x40] sm:$0xff] %v640_v39  ;;  %v654_v46 = vadd.f32 %v624_v24, %v545_v44  ;;  %v643_v47 = vadd.f32 %v628_v8, %v527_v45  ;;  %v547_v48 = vpop.f32.mrb[23].mxu1 }
 0x122   :  { %676 = vst [vmem:[#allocation3 + $0xa0] sm:$0xff] %v652_v42  ;;  %666 = vst [vmem:[#allocation3 + $0x50] sm:$0xff] %v642_v43  ;;  %v655_v49 = vadd.f32 %v628_v8, %v547_v48 }
 0x123   :  { %678 = vst [vmem:[#allocation3 + $0xb0] sm:$0xff] %v654_v46  ;;  %667 = vst [vmem:[#allocation3 + $0x58] sm:$0xff] %v643_v47 }
 0x124   :  { %679 = vst [vmem:[#allocation3 + $0xb8] sm:$0xff] %v655_v49 }
 0x125 LB: > { %v720_v53 = vld [vmem:[%s3248_s3 + $0x8] sm:$0xff]  ;;  %v723_v54 = vld [vmem:[%s3248_s3 + $0x20] sm:$0xff]  ;;  %v722_v57 = vld [vmem:[%s3248_s3 + $0x18] sm:$0xff]  ;;  %v2295_v60 = vmov 0.0|0.0   ;;  %v2296_v0 = vmov 0.0   ;;  %vm2297_vm0 = vmmov 0   ;;  %s2292_s5 = sphi %s2615_s5, %s700_s5   ;;  %v2288_v52 = vphi %v2613_v52, %v1505_v52   ;;  %v2284_v51 = vphi %v2611_v51, %v1511_v51   ;;  %v2280_v50 = vphi %v2609_v50, %v3254_v50  }
 0x126   : > { %v719_v55 = vld [vmem:[%s3248_s3] sm:$0xff]  ;;  %v2638_v56 = vpack.c.bf16 %v723_v54, %v720_v53  ;;  %v726_v58 = vld [vmem:[%s3248_s3 + $0x38] sm:$0xff]  ;;  %v729_v59 = vld [vmem:[%s3248_s3 + $0x50] sm:$0xff]  ;;  %1875 = vmatprep.subr.bf16.mxu1 %v2295_v60  ;;  %831 = vmatprep.mubr.f32.mxu0 %v2296_v0  ;;  %v2298_v15 = vmov 0   ;;  %s2668_s2 = sshll.u32 %s2292_s5, 1  ;;  %s1632_s30 = smul.u32 48, %s2292_s5 }
 0x127   : > { %v2651_v3 = vpack.c.bf16 %v722_v57, %v719_v55  ;;  %v2653_v4 = vpack.c.bf16 %v729_v59, %v726_v58  ;;  %v725_v12 = vld [vmem:[%s3248_s3 + $0x30] sm:$0xff]  ;;  %v728_v13 = vld [vmem:[%s3248_s3 + $0x48] sm:$0xff]  ;;  %1735 = vmatprep.mubr.msk.f32.mxu1 %vm2297_vm0, %v2296_v0  ;;  %2193 = vset.pattern.permute.xlu0 %v2298_v15  ;;  %v735_v16 = vld [vmem:[%s3248_s3 + $0x80] sm:$0xff]  ;;  %v1139_v17 = vstv %s2668_s2  ;;  %s706_s9 = ssub.s32 7, %s2668_s2  ;;  %s705_s28 = sadd.s32 1, %s2668_s2 }
 0x128   : > { %v732_v14 = vld [vmem:[%s3248_s3 + $0x68] sm:$0xff]  ;;  %1844 = vmatprep.subr.bf16.mxu0 %v2638_v56  ;;  %2194 = vset.pattern.permute.xlu1 %v2298_v15  ;;  %v2678_v18 = vpack.c.bf16 %v728_v13, %v725_v12  ;;  %vm1140_vm1 = vcmp.lt.s32.totalorder %v1139_v17, %v2533_v61  ;;  %v1141_v19 = vstv %s706_s9  ;;  %v731_v21 = vld [vmem:[%s3248_s3 + $0x60] sm:$0xff]  ;;  %v734_v22 = vld [vmem:[%s3248_s3 + $0x78] sm:$0xff]  ;;  %s1159_s29 = ssub.s32 6, %s2668_s2  ;;  %s3146_s10 = scalar_lea.vmem [#allocation2], %s1632_s30 }
 0x129   : > { %1846 = vmatpush1.bf16.msra.mxu0 %v2651_v3  ;;  %v2684_v20 = vpack.c.bf16 %v735_v16, %v732_v14  ;;  %v1143_v23 = vsel %vm1140_vm1, 1, %v2298_v15  ;;  %vm1142_vm2 = vcmp.lt.s32.totalorder %v1141_v19, %v2533_v61  ;;  %v738_v24 = vld [vmem:[%s3248_s3 + $0x98] sm:$0xff]  ;;  %v741_v8 = vld [vmem:[%s3248_s3 + $0xb0] sm:$0xff]  ;;  %v2702_v9 = vpack.c.bf16 %v734_v22, %v731_v21  ;;  %v740_v27 = vld [vmem:[%s3248_s3 + $0xa8] sm:$0xff]  ;;  %s1633_s11 = smul.u32 24, %s706_s9  ;;  %s700_s5 = sadd.s32 1, %s2292_s5  }
 0x12a   : > { %1848 = vmatprep.subr.bf16.mxu0 %v2653_v4  ;;  %1145 = vperm.xlu0 %2193, %v1143_v23   ;;  %v1149_v25 = vsel %vm1142_vm2, 1, %v2298_v15  ;;  %v737_v26 = vld [vmem:[%s3248_s3 + $0x90] sm:$0xff]  ;;  %v2708_v10 = vpack.c.bf16 %v741_v8, %v738_v24  ;;  %v724_v29 = vld [vmem:[%s3248_s3 + $0x28] sm:$0xff]  ;;  %v747_v11 = vld [vmem:[%s3248_s3 + $0xe0] sm:$0xff]  ;;  %s1634_s9 = smul.u32 24, %s1159_s29  ;;  %p697_p0 = scmp.ge.s32.totalorder %s700_s5, 4  }
 0x12b   : > { %v721_v28 = vld [vmem:[%s3248_s3 + $0x10] sm:$0xff]  ;;  %v744_v30 = vld [vmem:[%s3248_s3 + $0xc8] sm:$0xff]  ;;  %v727_v32 = vld [vmem:[%s3248_s3 + $0x40] sm:$0xff]  ;;  %v2734_v33 = vpack.c.bf16 %v740_v27, %v737_v26  ;;  %s3154_s12 = scalar_lea.vmem [#allocation3], %s1633_s11  ;;  %s2299_s2 = smov (%p697_p0), [#allocation4]  }
 0x12c   : > { %v2725_v31 = vpack.c.bf16 %v724_v29, %v721_v28  ;;  %v730_v6 = vld [vmem:[%s3248_s3 + $0x58] sm:$0xff]  ;;  %v743_v2 = vld [vmem:[%s3248_s3 + $0xc0] sm:$0xff]  ;;  %v2743_v5 = vpack.c.bf16 %v747_v11, %v744_v30  ;;  %v733_v35 = vld [vmem:[%s3248_s3 + $0x70] sm:$0xff]  ;;  %s3212_s1 = scalar_lea.vmem [#allocation3], %s1634_s9  ;;  %s1532_s6 = sshll.u32 (%p697_p0), %s2299_s2, 4  ;;  %s1533_s6 = int_to_ptr.vmem [resolvable:$true] %s1532_s6 }
 0x12d   : > { %1850 = vmatpush1.bf16.msra.mxu0 %v2678_v18  ;;  %v2740_v34 = vpack.c.bf16 %v730_v6, %v727_v32  ;;  %v746_v7 = vld [vmem:[%s3248_s3 + $0xd8] sm:$0xff]  ;;  %v736_v36 = vld [vmem:[%s3248_s3 + $0x88] sm:$0xff]  ;;  %v753_v38 = vld [vmem:[%s3248_s3 + $0x110] sm:$0xff]  ;;  %s2238_s7 = scalar_lea.vmem (%p697_p0), %s1533_s6, 128  ;;  %p2243_p2 = scmp.lt.s32.totalorder (%p697_p0), %s1533_s6, %s1533_s6 }
 0x12e   : > { %1852 = vmatprep.subr.bf16.mxu0 %v2684_v20  ;;  %1151 = vperm.xlu0 %2193, %v1149_v25   ;;  %v750_v37 = vld [vmem:[%s3248_s3 + $0xf8] sm:$0xff]  ;;  %v2762_v39 = vpack.c.bf16 %v746_v7, %v743_v2  ;;  %v749_v40 = vld [vmem:[%s3248_s3 + $0xf0] sm:$0xff]  ;;  %v2768_v41 = vpack.c.bf16 %v736_v36, %v733_v35  ;;  %v752_v43 = vld [vmem:[%s3248_s3 + $0x108] sm:$0xff]  ;;  %p2239_p1 = scmp.ne.s32.totalorder (%p697_p0), %s1533_s6, %s2238_s7  ;;  %p2244_p3 = scmp.lt.s32.totalorder (%p697_p0), %s2238_s7, %s2238_s7 }
 0x12f   : > { %1877 = vmatpush3.bf16.msra.mxu1 %v2725_v31  ;;  %v2771_v42 = vpack.c.bf16 %v753_v38, %v750_v37  ;;  %v739_v44 = vld [vmem:[%s3248_s3 + $0xa0] sm:$0xff]  ;;  %v742_v45 = vld [vmem:[%s3248_s3 + $0xb8] sm:$0xff]  ;;  %v756_v46 = vld [vmem:[%s3248_s3 + $0x128] sm:$0xff]  ;;  %v2790_v48 = vpack.c.bf16 %v752_v43, %v749_v40 }
 0x130   : > { %1878 = vmatprep.subr.bf16.mxu1 %v2295_v60  ;;  %v759_v47 = vld [vmem:[%s3248_s3 + $0x140] sm:$0xff]  ;;  %v2796_v53 = vpack.c.bf16 %v742_v45, %v739_v44  ;;  %v758_v55 = vld [vmem:[%s3248_s3 + $0x138] sm:$0xff]  ;;  %v745_v57 = vld [vmem:[%s3248_s3 + $0xd0] sm:$0xff]  ;;  %p2245_p4 = por (%p697_p0), %p2244_p3, %p2243_p2 }
 0x131   : > { %1854 = vmatpush1.bf16.msra.mxu0 %v2702_v9  ;;  %v755_v49 = vld [vmem:[%s3248_s3 + $0x120] sm:$0xff]  ;;  %v2799_v54 = vpack.c.bf16 %v759_v47, %v756_v46  ;;  %v748_v58 = vld [vmem:[%s3248_s3 + $0xe8] sm:$0xff]  ;;  %v762_v59 = vld [vmem:[%s3248_s3 + $0x158] sm:$0xff] }
 0x132   : > { %1856 = vmatprep.subr.bf16.mxu0 %v2708_v10  ;;  %v765_v12 = vld [vmem:[%s3248_s3 + $0x170] sm:$0xff]  ;;  %v2818_v13 = vpack.c.bf16 %v758_v55, %v755_v49  ;;  %v2824_v16 = vpack.c.bf16 %v748_v58, %v745_v57  ;;  %v764_v19 = vld [vmem:[%s3248_s3 + $0x168] sm:$0xff]  ;;  %v751_v21 = vld [vmem:[%s3248_s3 + $0x100] sm:$0xff]  ;;  %2235 = vset.pattern.permute.xlu0 (%p697_p0), %v2294_v1  ;;  %p2246_p5 = pnand (%p697_p0), %p2245_p4, %p2239_p1 }
 0x133   : > { %1880 = vmatpush3.bf16.msra.mxu1 %v2740_v34  ;;  %v761_v14 = vld [vmem:[%s3248_s3 + $0x150] sm:$0xff]  ;;  %v2827_v17 = vpack.c.bf16 %v765_v12, %v762_v59  ;;  %v754_v22 = vld [vmem:[%s3248_s3 + $0x118] sm:$0xff]  ;;  %v909_v23 = vld [vmem:[%s3249_s4 + $0x8] sm:$0xff] }
 0x134   : > { %1881 = vmatprep.subr.bf16.mxu1 %v2295_v60  ;;  %v912_v24 = vld [vmem:[%s3249_s4 + $0x20] sm:$0xff]  ;;  %v2846_v8 = vpack.c.bf16 %v764_v19, %v761_v14  ;;  %v2852_v26 = vpack.c.bf16 %v754_v22, %v751_v21  ;;  %v911_v28 = vld [vmem:[%s3249_s4 + $0x18] sm:$0xff]  ;;  %v757_v29 = vld [vmem:[%s3248_s3 + $0x130] sm:$0xff] }
 0x135   : > { %1858 = vmatpush1.bf16.msra.mxu0 %v2734_v33  ;;  %v908_v25 = vld [vmem:[%s3249_s4] sm:$0xff]  ;;  %v2855_v27 = vpack.c.bf16 %v912_v24, %v909_v23  ;;  %v760_v30 = vld [vmem:[%s3248_s3 + $0x148] sm:$0xff]  ;;  %v915_v11 = vld [vmem:[%s3249_s4 + $0x38] sm:$0xff] }
 0x136   : > { %1860 = vmatprep.subr.bf16.mxu0 %v2743_v5  ;;  %v918_v32 = vld [vmem:[%s3249_s4 + $0x50] sm:$0xff]  ;;  %v2874_v6 = vpack.c.bf16 %v911_v28, %v908_v25  ;;  %v2880_v7 = vpack.c.bf16 %v760_v30, %v757_v29  ;;  %v917_v36 = vld [vmem:[%s3249_s4 + $0x48] sm:$0xff]  ;;  %v763_v37 = vld [vmem:[%s3248_s3 + $0x160] sm:$0xff] }
 0x137   : > { %1883 = vmatpush3.bf16.msra.mxu1 %v2768_v41  ;;  %v914_v2 = vld [vmem:[%s3249_s4 + $0x30] sm:$0xff]  ;;  %v2883_v35 = vpack.c.bf16 %v918_v32, %v915_v11  ;;  %v766_v38 = vld [vmem:[%s3248_s3 + $0x178] sm:$0xff]  ;;  %v921_v40 = vld [vmem:[%s3249_s4 + $0x68] sm:$0xff] }
 0x138   : > { %1884 = vmatprep.subr.bf16.mxu1 %v2295_v60  ;;  %v924_v43 = vld [vmem:[%s3249_s4 + $0x80] sm:$0xff]  ;;  %v2903_v44 = vpack.c.bf16 %v917_v36, %v914_v2  ;;  %v2909_v46 = vpack.c.bf16 %v766_v38, %v763_v37  ;;  %v923_v49 = vld [vmem:[%s3249_s4 + $0x78] sm:$0xff]  ;;  %v910_v55 = vld [vmem:[%s3249_s4 + $0x10] sm:$0xff] }
 0x139   : > { %1862 = vmatpush1.bf16.msra.mxu0 %v2762_v39  ;;  %v920_v45 = vld [vmem:[%s3249_s4 + $0x60] sm:$0xff]  ;;  %v2912_v47 = vpack.c.bf16 %v924_v43, %v921_v40  ;;  %v913_v57 = vld [vmem:[%s3249_s4 + $0x28] sm:$0xff]  ;;  %v927_v58 = vld [vmem:[%s3249_s4 + $0x98] sm:$0xff] }
 0x13a   : > { %1864 = vmatprep.subr.bf16.mxu0 %v2771_v42  ;;  %v930_v59 = vld [vmem:[%s3249_s4 + $0xb0] sm:$0xff]  ;;  %v2932_v12 = vpack.c.bf16 %v923_v49, %v920_v45  ;;  %v2938_v19 = vpack.c.bf16 %v913_v57, %v910_v55  ;;  %v929_v22 = vld [vmem:[%s3249_s4 + $0xa8] sm:$0xff]  ;;  %v916_v23 = vld [vmem:[%s3249_s4 + $0x40] sm:$0xff] }
 0x13b   : > { %1886 = vmatpush3.bf16.msra.mxu1 %v2796_v53  ;;  %v926_v14 = vld [vmem:[%s3249_s4 + $0x90] sm:$0xff]  ;;  %v2941_v21 = vpack.c.bf16 %v930_v59, %v927_v58  ;;  %v919_v24 = vld [vmem:[%s3249_s4 + $0x58] sm:$0xff]  ;;  %v933_v25 = vld [vmem:[%s3249_s4 + $0xc8] sm:$0xff] }
 0x13c   : > { %1887 = vmatprep.subr.bf16.mxu1 %v2295_v60  ;;  %v936_v28 = vld [vmem:[%s3249_s4 + $0xe0] sm:$0xff]  ;;  %v2961_v29 = vpack.c.bf16 %v929_v22, %v926_v14  ;;  %v2967_v11 = vpack.c.bf16 %v919_v24, %v916_v23  ;;  %v935_v2 = vld [vmem:[%s3249_s4 + $0xd8] sm:$0xff]  ;;  %v922_v36 = vld [vmem:[%s3249_s4 + $0x70] sm:$0xff] }
 0x13d   : > { %1866 = vmatpush1.bf16.msra.mxu0 %v2790_v48  ;;  %v932_v30 = vld [vmem:[%s3249_s4 + $0xc0] sm:$0xff]  ;;  %v2970_v32 = vpack.c.bf16 %v936_v28, %v933_v25  ;;  %v925_v37 = vld [vmem:[%s3249_s4 + $0x88] sm:$0xff]  ;;  %v939_v38 = vld [vmem:[%s3249_s4 + $0xf8] sm:$0xff] }
 0x13e   : > { %1868 = vmatprep.subr.bf16.mxu0 %v2799_v54  ;;  %v942_v40 = vld [vmem:[%s3249_s4 + $0x110] sm:$0xff]  ;;  %v2991_v43 = vpack.c.bf16 %v935_v2, %v932_v30  ;;  %v2997_v49 = vpack.c.bf16 %v925_v37, %v922_v36  ;;  %v941_v57 = vld [vmem:[%s3249_s4 + $0x108] sm:$0xff]  ;;  %v928_v58 = vld [vmem:[%s3249_s4 + $0xa0] sm:$0xff] }
 0x13f   : > { %1889 = vmatpush3.bf16.msra.mxu1 %v2824_v16  ;;  %v938_v45 = vld [vmem:[%s3249_s4 + $0xf0] sm:$0xff]  ;;  %v3000_v55 = vpack.c.bf16 %v942_v40, %v939_v38  ;;  %v931_v59 = vld [vmem:[%s3249_s4 + $0xb8] sm:$0xff]  ;;  %v945_v14 = vld [vmem:[%s3249_s4 + $0x128] sm:$0xff] }
 0x140   : > { %1890 = vmatprep.subr.bf16.mxu1 %v2295_v60  ;;  %v948_v22 = vld [vmem:[%s3249_s4 + $0x140] sm:$0xff]  ;;  %v3019_v23 = vpack.c.bf16 %v941_v57, %v938_v45  ;;  %v3025_v25 = vpack.c.bf16 %v931_v59, %v928_v58  ;;  %v947_v30 = vld [vmem:[%s3249_s4 + $0x138] sm:$0xff]  ;;  %v934_v2 = vld [vmem:[%s3249_s4 + $0xd0] sm:$0xff] }
 0x141   : > { %1870 = vmatpush1.bf16.msra.mxu0 %v2818_v13  ;;  %v944_v24 = vld [vmem:[%s3249_s4 + $0x120] sm:$0xff]  ;;  %v3028_v28 = vpack.c.bf16 %v948_v22, %v945_v14  ;;  %v937_v36 = vld [vmem:[%s3249_s4 + $0xe8] sm:$0xff]  ;;  %v951_v37 = vld [vmem:[%s3249_s4 + $0x158] sm:$0xff] }
 0x142   : > { %1872 = vmatprep.subr.bf16.mxu0 %v2827_v17  ;;  %v954_v38 = vld [vmem:[%s3249_s4 + $0x170] sm:$0xff]  ;;  %v3047_v40 = vpack.c.bf16 %v947_v30, %v944_v24  ;;  %v3053_v57 = vpack.c.bf16 %v937_v36, %v934_v2  ;;  %v953_v59 = vld [vmem:[%s3249_s4 + $0x168] sm:$0xff]  ;;  %v940_v14 = vld [vmem:[%s3249_s4 + $0x100] sm:$0xff] }
 0x143   : > { %1892 = vmatpush3.bf16.msra.mxu1 %v2852_v26  ;;  %v950_v45 = vld [vmem:[%s3249_s4 + $0x150] sm:$0xff]  ;;  %v3056_v58 = vpack.c.bf16 %v954_v38, %v951_v37  ;;  %v943_v22 = vld [vmem:[%s3249_s4 + $0x118] sm:$0xff]  ;;  %v949_v36 = vld [vmem:[%s3249_s4 + $0x148] sm:$0xff] }
 0x144   : > { %1893 = vmatprep.subr.bf16.mxu1 %v2295_v60  ;;  %v3069_v24 = vpack.c.bf16 %v953_v59, %v950_v45  ;;  %v3072_v30 = vpack.c.bf16 %v943_v22, %v940_v14  ;;  %v946_v2 = vld [vmem:[%s3249_s4 + $0x130] sm:$0xff]  ;;  %v952_v38 = vld [vmem:[%s3249_s4 + $0x160] sm:$0xff]  ;;  %v955_v45 = vld [vmem:[%s3249_s4 + $0x178] sm:$0xff] }
 0x145   : > { %1874 = vmatpush1.bf16.msra.mxu0 %v2846_v8  ;;  %v3084_v37 = vpack.c.bf16 %v949_v36, %v946_v2  ;;  %v3096_v59 = vpack.c.bf16 %v955_v45, %v952_v38  ;;  %v717_v2 = vld [vmem:[%s3154_s12 + $0x8] sm:$0xff] }
 0x146   : > { %1900 = vmatprep.subr.bf16.mxu0 %v2855_v27 }
 0x147   : > { %1895 = vmatpush3.bf16.msra.mxu1 %v2880_v7 }
 0x148   : > { %832 = vmatmul.mubr.f32.vlgmr.msra.gmra.mrb[0].mxu0 %v2288_v52  ;;  %1896 = vmatprep.subr.bf16.mxu1 %v2295_v60 }
 0x149   : > { %1902 = vmatpush1.bf16.msra.mxu0 %v2874_v6  ;;  %1020 = vmatprep.mubr.f32.mxu0 %v2296_v0 }
 0x14a   : > { %1904 = vmatprep.subr.bf16.mxu0 %v2883_v35 }
 0x14b   : > { %1898 = vmatpush3.bf16.msra.mxu1 %v2909_v46 }
 0x14c   : > { %1931 = vmatprep.subr.bf16.mxu1 %v2295_v60 }
 0x14d   : > { %1906 = vmatpush1.bf16.msra.mxu0 %v2903_v44 }
 0x14e   : > { %1908 = vmatprep.subr.bf16.mxu0 %v2912_v47  ;;  %1736 = vmatmul.mubr.f32.vlgmr.msra.gmra.mrb[0].mxu1 %v2288_v52 }
 0x14f   : > { %1933 = vmatpush3.bf16.msra.mxu1 %v2938_v19  ;;  %1770 = vmatprep.mubr.msk.f32.mxu1 %vm2297_vm0, %v2296_v0 }
 0x150   : > { %1934 = vmatprep.subr.bf16.mxu1 %v2295_v60 }
 0x151   : > { %1910 = vmatpush1.bf16.msra.mxu0 %v2932_v12 }
 0x152   : > { %1912 = vmatprep.subr.bf16.mxu0 %v2941_v21 }
 0x153   : > { %1936 = vmatpush3.bf16.msra.mxu1 %v2967_v11 }
 0x154   : > { %1937 = vmatprep.subr.bf16.mxu1 %v2295_v60 }
 0x155   : > { %1914 = vmatpush1.bf16.msra.mxu0 %v2961_v29 }
 0x156   : > { %1916 = vmatprep.subr.bf16.mxu0 %v2970_v32 }
 0x157   : > { %1939 = vmatpush3.bf16.msra.mxu1 %v2997_v49 }
 0x158   : > { %1940 = vmatprep.subr.bf16.mxu1 %v2295_v60 }
 0x159   : > { %1918 = vmatpush1.bf16.msra.mxu0 %v2991_v43 }
 0x15a   : > { %1920 = vmatprep.subr.bf16.mxu0 %v3000_v55 }
 0x15b   : > { %1942 = vmatpush3.bf16.msra.mxu1 %v3025_v25 }
 0x15c   : > { %1943 = vmatprep.subr.bf16.mxu1 %v2295_v60 }
 0x15d   : > { %1922 = vmatpush1.bf16.msra.mxu0 %v3019_v23 }
 0x15e   : > { %1924 = vmatprep.subr.bf16.mxu0 %v3028_v28 }
 0x15f   : > { %1945 = vmatpush3.bf16.msra.mxu1 %v3053_v57 }
 0x160   : > { %1946 = vmatprep.subr.bf16.mxu1 %v2295_v60 }
 0x161   : > { %1926 = vmatpush1.bf16.msra.mxu0 %v3047_v40 }
 0x162   : > { %1928 = vmatprep.subr.bf16.mxu0 %v3056_v58 }
 0x163   : > { %1948 = vmatpush3.bf16.msra.mxu1 %v3072_v30 }
 0x164   : > { %1949 = vmatprep.subr.bf16.mxu1 %v2295_v60 }
 0x165   : > { %1930 = vmatpush1.bf16.msra.mxu0 %v3069_v24 }
 0x166   : > { %1956 = vmatprep.subr.bf16.mxu0 %v2638_v56  ;;  %v1496_v56 = vstv %s705_s28 }
 0x167   : > { %1951 = vmatpush3.bf16.msra.mxu1 %v3084_v37  ;;  %vm1497_vm3 = vcmp.lt.s32.totalorder %v1496_v56, %v2533_v61 }
 0x168   : > { %1021 = vmatmul.mubr.f32.vlgmr.msra.gmra.mrb[2].mxu0 %v2284_v51  ;;  %1952 = vmatprep.subr.bf16.mxu1 %v2295_v60 }
 0x169   : > { %1958 = vmatpush1.bf16.msra.mxu0 %v2651_v3  ;;  %1236 = vmatprep.mubr.f32.mxu0 %v2296_v0  ;;  %v1498_v3 = vstv %s1159_s29 }
 0x16a   : > { %1960 = vmatprep.subr.bf16.mxu0 %v2653_v4  ;;  %vm1499_vm4 = vcmp.lt.s32.totalorder %v1498_v3, %v2533_v61  ;;  %v1500_v4 = vsel %vm1497_vm3, 1, %v2298_v15 }
 0x16b   : > { %1954 = vmatpush3.bf16.msra.mxu1 %v3096_v59  ;;  %1502 = vperm.xlu1 %2194, %v1500_v4  }
 0x16c   : > { %1987 = vmatprep.subr.bf16.mxu1 %v2295_v60 }
 0x16d   : > { %1962 = vmatpush1.bf16.msra.mxu0 %v2678_v18  ;;  %v1506_v18 = vsel %vm1499_vm4, 1, %v2298_v15 }
 0x16e   : > { %1964 = vmatprep.subr.bf16.mxu0 %v2684_v20  ;;  %1771 = vmatmul.mubr.f32.vlgmr.msra.gmra.mrb[2].mxu1 %v2284_v51  ;;  %v710_v20 = vld [vmem:[%s3146_s10] sm:$0xff] }
 0x16f   : > { %1989 = vmatpush3.bf16.msra.mxu1 %v2725_v31  ;;  %1805 = vmatprep.mubr.msk.f32.mxu1 %vm2297_vm0, %v2296_v0 }
 0x170   : > { %1990 = vmatprep.subr.bf16.mxu1 %v2295_v60  ;;  %1508 = vperm.xlu1 %2194, %v1506_v18  }
 0x171   : > { %1966 = vmatpush1.bf16.msra.mxu0 %v2702_v9 }
 0x172   : > { %1968 = vmatprep.subr.bf16.mxu0 %v2708_v10 }
 0x173   : > { %1992 = vmatpush3.bf16.msra.mxu1 %v2740_v34  ;;  %v711_v34 = vld [vmem:[%s3146_s10 + $0x8] sm:$0xff] }
 0x174   : > { %1993 = vmatprep.subr.bf16.mxu1 %v2295_v60 }
 0x175   : > { %1970 = vmatpush1.bf16.msra.mxu0 %v2734_v33 }
 0x176   : > { %1972 = vmatprep.subr.bf16.mxu0 %v2743_v5 }
 0x177   : > { %1995 = vmatpush3.bf16.msra.mxu1 %v2768_v41 }
 0x178   : > { %1996 = vmatprep.subr.bf16.mxu1 %v2295_v60 }
 0x179   : > { %1974 = vmatpush1.bf16.msra.mxu0 %v2762_v39 }
 0x17a   : > { %1976 = vmatprep.subr.bf16.mxu0 %v2771_v42 }
 0x17b   : > { %1998 = vmatpush3.bf16.msra.mxu1 %v2796_v53 }
 0x17c   : > { %1999 = vmatprep.subr.bf16.mxu1 %v2295_v60 }
 0x17d   : > { %1978 = vmatpush1.bf16.msra.mxu0 %v2790_v48 }
 0x17e   : > { %1980 = vmatprep.subr.bf16.mxu0 %v2799_v54 }
 0x17f   : > { %2001 = vmatpush3.bf16.msra.mxu1 %v2824_v16  ;;  %v712_v16 = vld [vmem:[%s3146_s10 + $0x10] sm:$0xff] }
 0x180   : > { %2002 = vmatprep.subr.bf16.mxu1 %v2295_v60 }
 0x181   : > { %1982 = vmatpush1.bf16.msra.mxu0 %v2818_v13 }
 0x182   : > { %1984 = vmatprep.subr.bf16.mxu0 %v2827_v17 }
 0x183   : > { %2004 = vmatpush3.bf16.msra.mxu1 %v2852_v26 }
 0x184   : > { %2005 = vmatprep.subr.bf16.mxu1 %v2295_v60 }
 0x185   : > { %1986 = vmatpush1.bf16.msra.mxu0 %v2846_v8  ;;  %v716_v8 = vld [vmem:[%s3154_s12] sm:$0xff] }
 0x186   : > { %2012 = vmatprep.subr.bf16.mxu0 %v2855_v27 }
 0x187   : > { %2007 = vmatpush3.bf16.msra.mxu1 %v2880_v7 }
 0x188   : > { %2008 = vmatprep.subr.bf16.mxu1 %v2295_v60 }
 0x18b   : > { %2010 = vmatpush3.bf16.msra.mxu1 %v2909_v46 }
 0x18c   : > { %2043 = vmatprep.subr.bf16.mxu1 %v2295_v60 }
 0x21b   : > { %v833_v9 = vpop.f32.mrb[0].mxu0 }
 0x21c   : > { %v1097_v10 = vadd.f32 %v833_v9, %v710_v20  ;;  %v835_v31 = vpop.f32.mrb[1].mxu0  ;;  %v1146_v20 = vpop.permute.xlu0 %1145 }
 0x21d   : > { %v1098_v39 = vadd.f32 %v835_v31, %v711_v34  ;;  %vm1147_vm5 = vcmp.eq.s32.totalorder %v1146_v20, 1 }
 0x21e   : > { %v1618_v33 = vmul.f32 -1.442695, %v1097_v10 }
 0x21f   : > { %v1619_v42 = vmul.f32 -1.442695, %v1098_v39 }
 0x220   : > { %2195 = vpow2.f32 %v1618_v33 }
 0x221   : > { %v904_v5 = vpop.f32.mrb[0].mxu1  ;;  %2197 = vpow2.f32 %v1619_v42 }
 0x222   : > { %v1737_v41 = vpop.f32.mrb[1].mxu1  ;;  %v1125_v53 = vadd.f32 %v2538_v62, %v904_v5 }
 0x22a   : > { %v2196_v15 = vpop.eup %2195 }
 0x22b   : > { %v1105_v48 = vadd.f32 1.0, %v2196_v15  ;;  %v2198_v54 = vpop.eup %2197 }
 0x22c   : > { %v1106_v26 = vadd.f32 1.0, %v2198_v54  ;;  %v1169_v54 = vld [vmem:[%s3212_s1] sm:$0xff] }
 0x22d   : > { %2199 = vrcp.f32 %v1105_v48  ;;  %v1626_v48 = vld [vmem:[%s3146_s10 + $0x28] sm:$0xff] }
 0x237   : > { %v2200_v13 = vpop.eup %2199 }
 0x238   : > { %v1126_v17 = vmul.f32 %v2200_v13, %v1125_v53 }
 0x23a   : > { %v1127_v27 = vadd.f32 %v1126_v17, %v712_v16 }
 0x23b   : > { %v1022_v7 = vpop.f32.mrb[2].mxu0 }
 0x23c   : > { %2201 = vtanh.f32 %v1127_v27  ;;  %v1111_v46 = vadd.f32 %v1022_v7, %v716_v8  ;;  %v1024_v14 = vpop.f32.mrb[3].mxu0 }
 0x23d   : > { %2203 = vrcp.f32 %v1106_v26  ;;  %v1112_v38 = vadd.f32 %v1024_v14, %v717_v2  ;;  %v1170_v14 = vld [vmem:[%s3212_s1 + $0x8] sm:$0xff] }
 0x23e   : > { %v1620_v22 = vmul.f32 -1.442695, %v1111_v46 }
 0x23f   : > { %v1621_v18 = vmul.f32 -1.442695, %v1112_v38 }
 0x240   : > { %2205 = vpow2.f32 %v1620_v22 }
 0x241   : > { %v1093_v36 = vpop.f32.mrb[2].mxu1  ;;  %2207 = vpow2.f32 %v1621_v18 }
 0x242   : > { %v1772_v45 = vpop.f32.mrb[3].mxu1 }
 0x246   : > { %v2202_v56 = vpop.eup %2201 }
 0x247   : > { %v1133_v3 = vsub.f32 %v2288_v52, %v2202_v56  ;;  %v2204_v4 = vpop.eup %2203 }
 0x249   : > { %v1134_v9 = vmul.f32 %v2204_v4, %v1133_v3 }
 0x24a   : > { %v2206_v10 = vpop.eup %2205 }
 0x24b   : > { %v1119_v31 = vadd.f32 1.0, %v2206_v10  ;;  %v1135_v33 = vadd.f32 %v2202_v56, %v1134_v9 }
 0x24d   : > { %2209 = vrcp.f32 %v1119_v31  ;;  %v3160_v34 = vsel %vm1147_vm5, %v1135_v33, %v2288_v52  ;;  %v1155_v5 = vsel %vm1147_vm5, %v1135_v33, 0.0  ;;  %v1129_v52 = vadd.f32 %v2543_v63, %v1093_v36  ;;  %v1503_v36 = vpop.permute.xlu1 %1502 }
 0x24e   : > { %1237 = vmatmul.mubr.f32.vlgmr.msra.gmra.mrb[4].mxu0 %v3160_v34  ;;  %1806 = vmatmul.mubr.f32.vlgmr.msra.gmra.mrb[4].mxu1 %v3160_v34  ;;  %vm1504_vm7 = vcmp.eq.s32.totalorder %v1503_v36, 1 }
 0x24f   : > { %2014 = vmatpush1.bf16.msra.mxu0 %v2874_v6  ;;  %2045 = vmatpush3.bf16.msra.mxu1 %v2938_v19  ;;  %v2208_v6 = vpop.eup %2207 }
 0x250   : > { %2016 = vmatprep.subr.bf16.mxu0 %v2883_v35  ;;  %2046 = vmatprep.subr.bf16.mxu1 %v2295_v60  ;;  %v718_v35 = vld [vmem:[%s3154_s12 + $0x10] sm:$0xff] }
 0x251   : > { %1377 = vmatprep.mubr.f32.mxu0 %v2296_v0  ;;  %1840 = vmatprep.mubr.msk.f32.mxu1 %vm2297_vm0, %v2296_v0  ;;  %v1120_v0 = vadd.f32 1.0, %v2208_v6  ;;  %v1171_v6 = vld [vmem:[%s3212_s1 + $0x10] sm:$0xff] }
 0x253   : > { %2018 = vmatpush1.bf16.msra.mxu0 %v2903_v44  ;;  %2048 = vmatpush3.bf16.msra.mxu1 %v2967_v11 }
 0x254   : > { %2020 = vmatprep.subr.bf16.mxu0 %v2912_v47  ;;  %2049 = vmatprep.subr.bf16.mxu1 %v2295_v60 }
 0x257   : > { %v2210_v19 = vpop.eup %2209  ;;  %2022 = vmatpush1.bf16.msra.mxu0 %v2932_v12  ;;  %2051 = vmatpush3.bf16.msra.mxu1 %v2997_v49 }
 0x258   : > { %v1130_v39 = vmul.f32 %v2210_v19, %v1129_v52  ;;  %2024 = vmatprep.subr.bf16.mxu0 %v2941_v21  ;;  %2052 = vmatprep.subr.bf16.mxu1 %v2295_v60 }
 0x25a   : > { %v1131_v44 = vadd.f32 %v1130_v39, %v718_v35 }
 0x25b   : > { %2026 = vmatpush1.bf16.msra.mxu0 %v2961_v29  ;;  %2054 = vmatpush3.bf16.msra.mxu1 %v3025_v25  ;;  %v1152_v29 = vpop.permute.xlu0 %1151 }
 0x25c   : > { %2211 = vtanh.f32 %v1131_v44  ;;  %2028 = vmatprep.subr.bf16.mxu0 %v2970_v32  ;;  %2055 = vmatprep.subr.bf16.mxu1 %v2295_v60  ;;  %vm1153_vm6 = vcmp.eq.s32.totalorder %v1152_v29, 1 }
 0x25d   : > { %2213 = vrcp.f32 %v1120_v0 }
 0x25f   : > { %2030 = vmatpush1.bf16.msra.mxu0 %v2991_v43  ;;  %2057 = vmatpush3.bf16.msra.mxu1 %v3053_v57  ;;  %v1156_v43 = vadd.f32 %v2280_v50, %v1155_v5  ;;  %v1625_v50 = vld [vmem:[%s3146_s10 + $0x20] sm:$0xff] }
 0x260   : > { %2032 = vmatprep.subr.bf16.mxu0 %v3000_v55  ;;  %2058 = vmatprep.subr.bf16.mxu1 %v2295_v60 }
 0x263   : > { %2034 = vmatpush1.bf16.msra.mxu0 %v3019_v23  ;;  %2060 = vmatpush3.bf16.msra.mxu1 %v3072_v30  ;;  %v1624_v23 = vld [vmem:[%s3146_s10 + $0x18] sm:$0xff] }
 0x264   : > { %2036 = vmatprep.subr.bf16.mxu0 %v3028_v28  ;;  %2061 = vmatprep.subr.bf16.mxu1 %v2295_v60 }
 0x266   : > { %v2212_v47 = vpop.eup %2211 }
 0x267   : > { %2038 = vmatpush1.bf16.msra.mxu0 %v3047_v40  ;;  %2063 = vmatpush3.bf16.msra.mxu1 %v3084_v37  ;;  %v1136_v12 = vsub.f32 %v2284_v51, %v2212_v47  ;;  %v2214_v21 = vpop.eup %2213 }
 0x268   : > { %2040 = vmatprep.subr.bf16.mxu0 %v3056_v58  ;;  %2064 = vmatprep.subr.bf16.mxu1 %v2295_v60 }
 0x269   : > { %v1137_v11 = vmul.f32 %v2214_v21, %v1136_v12  ;;  %v1509_v12 = vpop.permute.xlu1 %1508 }
 0x26a   : > { %vm1510_vm8 = vcmp.eq.s32.totalorder %v1509_v12, 1 }
 0x26b   : > { %2042 = vmatpush1.bf16.msra.mxu0 %v3069_v24  ;;  %2066 = vmatpush3.bf16.msra.mxu1 %v3096_v59  ;;  %v1138_v32 = vadd.f32 %v2212_v47, %v1137_v11 }
 0x26d   : > { %v3202_v49 = vsel %vm1153_vm6, %v1138_v32, %v2284_v51  ;;  %v1157_v55 = vsel %vm1153_vm6, %v1138_v32, 0.0  ;;  %v1516_v32 = vcvt.s32.f32 (%p697_p0), %v2533_v61 }
 0x26e   : > { %1378 = vmatmul.mubr.f32.vlgmr.msra.gmra.mrb[6].mxu0 %v3202_v49  ;;  %1841 = vmatmul.mubr.f32.vlgmr.msra.gmra.mrb[6].mxu1 %v3202_v49  ;;  %v1158_v60 = vadd.f32 %v1157_v55, %v1156_v43 }
 0x26f   :  { %v1517_v43 = vmax.f32 (%p697_p0), %v1516_v32, 1.0 }
 0x271   :  { %1520 = vperm.xlu0 (%p697_p0), %2235, %v1517_v43  }
 0x321   : > { %v1238_v25 = vpop.f32.mrb[4].mxu0  ;;  %v1309_v28 = vpop.f32.mrb[4].mxu1 }
 0x322   : > { %v1454_v40 = vadd.f32 %v1624_v23, %v1238_v25  ;;  %v1240_v57 = vpop.f32.mrb[5].mxu0  ;;  %v1807_v58 = vpop.f32.mrb[5].mxu1  ;;  %v1482_v42 = vadd.f32 %v2538_v62, %v1309_v28 }
 0x323   : > { %v1455_v30 = vadd.f32 %v1625_v50, %v1240_v57 }
 0x324   : > { %v1628_v24 = vmul.f32 -1.442695, %v1454_v40 }
 0x325   : > { %v1629_v51 = vmul.f32 -1.442695, %v1455_v30 }
 0x326   : > { %2215 = vpow2.f32 %v1628_v24 }
 0x327   : > { %2217 = vpow2.f32 %v1629_v51 }
 0x330   : > { %v2216_v37 = vpop.eup %2215 }
 0x331   : > { %v1462_v59 = vadd.f32 1.0, %v2216_v37  ;;  %v2218_v41 = vpop.eup %2217 }
 0x332   : > { %v1463_v16 = vadd.f32 1.0, %v2218_v41 }
 0x333   : > { %2219 = vrcp.f32 %v1462_v59 }
 0x33d   : > { %v2220_v15 = vpop.eup %2219 }
 0x33e   : > { %v1483_v53 = vmul.f32 %v2220_v15, %v1482_v42 }
 0x340   : > { %v1484_v13 = vadd.f32 %v1626_v48, %v1483_v53 }
 0x341   : > { %v1379_v17 = vpop.f32.mrb[6].mxu0  ;;  %v1450_v8 = vpop.f32.mrb[6].mxu1 }
 0x342   : > { %2221 = vtanh.f32 %v1484_v13  ;;  %v1468_v26 = vadd.f32 %v1379_v17, %v1169_v54  ;;  %v1381_v27 = vpop.f32.mrb[7].mxu0  ;;  %v1842_v7 = vpop.f32.mrb[7].mxu1  ;;  %v1486_v33 = vadd.f32 %v2543_v63, %v1450_v8 }
 0x343   : > { %2223 = vrcp.f32 %v1463_v16  ;;  %v1469_v22 = vadd.f32 %v1381_v27, %v1170_v14 }
 0x344   : > { %v1630_v46 = vmul.f32 -1.442695, %v1468_v26 }
 0x345   : > { %v1631_v56 = vmul.f32 -1.442695, %v1469_v22 }
 0x346   : > { %2225 = vpow2.f32 %v1630_v46 }
 0x347   : > { %2227 = vpow2.f32 %v1631_v56 }
 0x34c   : > { %v2222_v2 = vpop.eup %2221 }
 0x34d   : > { %v1490_v38 = vsub.f32 %v3160_v34, %v2222_v2  ;;  %v2224_v45 = vpop.eup %2223 }
 0x34f   : > { %v1491_v3 = vmul.f32 %v2224_v45, %v1490_v38 }
 0x350   : > { %v2226_v4 = vpop.eup %2225 }
 0x351   : > { %v1476_v18 = vadd.f32 1.0, %v2226_v4  ;;  %v1492_v20 = vadd.f32 %v2222_v2, %v1491_v3  ;;  %v2228_v31 = vpop.eup %2227 }
 0x352   : > { %v1477_v39 = vadd.f32 1.0, %v2228_v31 }
 0x353   : > { %2229 = vrcp.f32 %v1476_v18  ;;  %v1505_v52 = vsel %vm1504_vm7, %v1492_v20, %v3160_v34   ;;  %v1512_v9 = vsel %vm1504_vm7, %v1492_v20, 0.0 }
 0x354   : > { %v1513_v10 = vadd.f32 %v1512_v9, %v1158_v60 }
 0x35d   : > { %v2230_v5 = vpop.eup %2229 }
 0x35e   : > { %v1487_v19 = vmul.f32 %v2230_v5, %v1486_v33 }
 0x360   : > { %v1488_v35 = vadd.f32 %v1487_v19, %v1171_v6 }
 0x362   : > { %2231 = vtanh.f32 %v1488_v35 }
 0x363   : > { %2233 = vrcp.f32 %v1477_v39 }
 0x36c   : > { %v2232_v0 = vpop.eup %2231 }
 0x36d   : > { %v1493_v44 = vsub.f32 %v3202_v49, %v2232_v0  ;;  %v2234_v47 = vpop.eup %2233 }
 0x36f   : > { %v1494_v21 = vmul.f32 %v2234_v47, %v1493_v44 }
 0x370   :  { %699 = sbr.rel (!%p697_p0) target bundleno = 293 (0x125), region = 63 }
 0x371   : > { %v1495_v29 = vadd.f32 %v2232_v0, %v1494_v21 }
 0x373   : > { %v1511_v51 = vsel %vm1510_vm8, %v1495_v29, %v3202_v49   ;;  %v1514_v34 = vsel %vm1510_vm8, %v1495_v29, 0.0  ;;  %v1521_v49 = vpop.permute.xlu0 (%p697_p0), %1520 }
 0x374   : > { %v1515_v11 = vadd.f32 %v1514_v34, %v1513_v10   ;;  %2236 = vrcp.f32 (%p697_p0), %v1521_v49 }
 0x376   : > { %v3254_v50 = vmov %v1515_v11 }
 0x37e   :  { %v2237_v55 = vpop.eup %2236 }
 0x37f   :  { %v1524_v60 = vmul.f32 %v2237_v55, %v1515_v11 }
 0x381   :  { %1525 = vst [vmem:[#allocation4] sm:$0xff] %v1524_v60 }
 0x382   :  { %2249 = shalt.err (!%p2246_p5)
}
 0x383   :  { %s2250_s5 = scalar_lea.hbm %s3253_s8, 128 }
 0x384   :  { %p2251_p6 = scmp.ne.s32.totalorder %s3253_s8, %s2250_s5  ;;  %p2254_p7 = scmp.lt.u32.totalorder %s2250_s5, %s3253_s8 }
 0x386   :  { %p2256_p8 = pnand %p2254_p7, %p2251_p6 }
 0x388   :  { %2259 = shalt.err (!%p2256_p8)
}
 0x389   :  { %1535 = dma.vmem_to_hbm [thread:$0]  %s1533_s6, 128, %s3253_s8, [#allocation5]  }
 0x38a   :  { %2276 = dma.done.wait [#allocation5], 128  }
 0x38b   :  { %2277 = vsyncadd [#allocation5], 4294967168 }
 0x38c   :  { %1539 = vsyncpa [#allocation5], 1 }

</bundles_post_ra>
